<compile_context>
chip_gen: v7x
topology: tpu7x:2x2x1
jax: 0.10.0
libtpu: 0.0.40
codegen_flags: <defaults>
</compile_context>

<pallas_src>
import functools

import jax
import jax.numpy as jnp
from jax import lax
from jax.experimental import pallas as pl
from jax.experimental.pallas import tpu as pltpu


def _softmax_rows(s):
    """Numerically stable softmax over the last axis; s is f32, result f32."""
    m = jnp.max(s, axis=-1, keepdims=True)
    p = jnp.exp(s - m)
    denom = jnp.sum(p, axis=-1, keepdims=True)
    return p * pl.reciprocal(denom, approx=True)


def _attn_self_kernel(x_ref, wqkv_ref, wp_ref, b_ref, o_ref,
                      *, num_heads, head_dim, n, cdt):
    C = num_heads * head_dim
    x2d = x_ref[0]                                               # (n, C) cdt

    # QKV projection: contract channel dim of both operands (no transposes).
    qkvT = lax.dot_general(wqkv_ref[...], x2d,
                           dimension_numbers=(((1,), (1,)), ((), ())),
                           preferred_element_type=jnp.float32)   # (3C, n)
    qkvT = qkvT.astype(cdt)                                      # cast once
    qkv = qkvT.reshape(3, num_heads, head_dim, n)                # leading split
    q, k, v = qkv[0], qkv[1], qkv[2]                             # (H, hd, n)

    # Scores: contract head_dim of both operands, batch over heads.
    s = lax.dot_general(q, k,
                        dimension_numbers=(((1,), (1,)), ((0,), (0,))),
                        preferred_element_type=jnp.float32)      # (H, n, n) f32
    p = _softmax_rows(s).astype(cdt)

    # Context: contract key dim of both operands, batch over heads.
    ctx = lax.dot_general(v, p,
                          dimension_numbers=(((2,), (2,)), ((0,), (0,))),
                          preferred_element_type=jnp.float32)    # (H, hd, n)
    ctx = ctx.astype(cdt).reshape(C, n)                          # leading merge

    # Output projection: contract channel dim -> directly (n, C), no final .T
    out = lax.dot_general(ctx, wp_ref[...],
                          dimension_numbers=(((0,), (1,)), ((), ())),
                          preferred_element_type=jnp.float32)    # (n, C)
    o_ref[0] = (out + b_ref[...]).astype(o_ref.dtype)


def _attn_pair_kernel(xs_ref, wqkv_ref, wp_ref, b_ref, o_ref,
                      *, num_heads, head_dim, n, cdt):
    C = num_heads * head_dim
    # xs block is (1, 2, n, C): source 0 = x, source 1 = x_t (stacked on host).
    xs2 = xs_ref[0].reshape(2 * n, C)                            # rows [x ; x_t]

    # One stacked QKV projection for both sources.
    qkvT = lax.dot_general(wqkv_ref[...], xs2,
                           dimension_numbers=(((1,), (1,)), ((), ())),
                           preferred_element_type=jnp.float32)   # (3C, 2n)
    qkvT = qkvT.astype(cdt)                                      # cast once
    qkv = qkvT.reshape(3, num_heads, head_dim, 2 * n)            # leading split
    q, k, v = qkv[0], qkv[1], qkv[2]                             # (H, hd, 2n)
    k0, k1 = k[:, :, :n], k[:, :, n:]                            # keys of x / x_t
    v0, v1 = v[:, :, :n], v[:, :, n:]

    def attend(kk, vv):
        # All 2n queries (x then x_t) against one key/value source.
        s = lax.dot_general(q, kk,
                            dimension_numbers=(((1,), (1,)), ((0,), (0,))),
                            preferred_element_type=jnp.float32)  # (H, 2n, n) f32
        p = _softmax_rows(s).astype(cdt)
        ctx = lax.dot_general(vv, p,
                              dimension_numbers=(((2,), (2,)), ((0,), (0,))),
                              preferred_element_type=jnp.float32)  # (H, hd, 2n)
        ctx = ctx.astype(cdt).reshape(C, 2 * n)
        out = lax.dot_general(ctx, wp_ref[...],
                              dimension_numbers=(((0,), (1,)), ((), ())),
                              preferred_element_type=jnp.float32)  # (2n, C)
        return out + b_ref[...]

    out_kv_x = attend(k0, v0)    # rows 0..n -> x ; rows n..2n -> x_ts (q_t,k,v)
    out_kv_xt = attend(k1, v1)   # rows 0..n -> x_st (q,k_t,v_t) ; rows n..2n -> x_t

    dt = o_ref.dtype
    o_ref[0, 0] = out_kv_x[:n].astype(dt)     # x
    o_ref[0, 1] = out_kv_xt[n:].astype(dt)    # x_t
    o_ref[0, 2] = out_kv_x[n:].astype(dt)     # x_ts
    o_ref[0, 3] = out_kv_xt[:n].astype(dt)    # x_st


def attention_forward(x, x_t, w_qkv, w_proj, b_proj, num_heads):
    """Mirrors Attention.forward.  Returns (x, x_t, x_ts, x_st) like the module."""
    B, N, C = x.shape
    assert C % num_heads == 0
    head_dim = C // num_heads
    scale = head_dim ** (-0.5)
    out_dtype = x.dtype

    # bf16 MXU operands only on a real TPU backend; f32 elsewhere (CPU/interpret
    # backends reject BF16 x BF16 = F32 dots).  Accumulation is f32 either way.
    on_tpu = jax.default_backend() == "tpu"
    cdt = jnp.bfloat16 if on_tpu else jnp.float32

    # Fold the attention scale into the q rows of w_qkv (exact: qkv_bias=False,
    # q_norm/k_norm are Identity).
    w_qkv_scaled = jnp.concatenate([w_qkv[:C] * scale, w_qkv[C:]], axis=0)
    wqkv_c = w_qkv_scaled.astype(cdt)                 # (3C, C), native (out, in)
    wp_c = w_proj.astype(cdt)                         # (C, C),  native (out, in)
    bias = b_proj.reshape(1, C).astype(jnp.float32)

    cp_kwargs = dict(dimension_semantics=("parallel",))
    if on_tpu:
        # Don't hard-code a VMEM limit (64 MiB == all of v7x); derive with headroom.
        try:
            cap = getattr(pltpu.get_tpu_info(), "vmem_capacity_bytes", None)
            if cap:
                cp_kwargs["vmem_limit_bytes"] = int(cap) * 3 // 4
        except Exception:
            pass
    cparams = pltpu.CompilerParams(**cp_kwargs)

    wqkv_spec = pl.BlockSpec((3 * C, C), lambda i: (0, 0))
    wp_spec = pl.BlockSpec((C, C), lambda i: (0, 0))
    b_spec = pl.BlockSpec((1, C), lambda i: (0, 0))
    grid = (B,)

    if x_t is None:
        kern = functools.partial(_attn_self_kernel, num_heads=num_heads,
                                 head_dim=head_dim, n=N, cdt=cdt)
        out = pl.pallas_call(
            kern,
            out_shape=jax.ShapeDtypeStruct((B, N, C), out_dtype),
            grid=grid,
            in_specs=[pl.BlockSpec((1, N, C), lambda i: (i, 0, 0)),
                      wqkv_spec, wp_spec, b_spec],
            out_specs=pl.BlockSpec((1, N, C), lambda i: (i, 0, 0)),
            compiler_params=cparams,
        )(x.astype(cdt), wqkv_c, wp_c, bias)
        return out, None, None, None

    # Stack the two sources on the host -> single activation block per step.
    xs = jnp.stack([x, x_t], axis=1).astype(cdt)      # (B, 2, N, C)
    kern = functools.partial(_attn_pair_kernel, num_heads=num_heads,
                             head_dim=head_dim, n=N, cdt=cdt)
    packed = pl.pallas_call(
        kern,
        out_shape=jax.ShapeDtypeStruct((B, 4, N, C), out_dtype),
        grid=grid,
        in_specs=[pl.BlockSpec((1, 2, N, C), lambda i: (i, 0, 0, 0)),
                  wqkv_spec, wp_spec, b_spec],
        out_specs=pl.BlockSpec((1, 4, N, C), lambda i: (i, 0, 0, 0)),
        compiler_params=cparams,
    )(xs, wqkv_c, wp_c, bias)
    return packed[:, 0], packed[:, 1], packed[:, 2], packed[:, 3]


# ---------------- pure-JAX reference (for verification only) ----------------
def _reference(x, x_t, w_qkv, w_proj, b_proj, num_heads):
    B, N, C = x.shape
    hd = C // num_heads
    scale = hd ** (-0.5)

    def split_qkv(z):
        qkv = (z @ w_qkv.T).reshape(B, N, 3, num_heads, hd)
        qkv = jnp.transpose(qkv, (2, 0, 3, 1, 4))
        return qkv[0], qkv[1], qkv[2]                 # each (B, H, N, hd)

    def attn(q, k, v):
        q = q * scale
        a = jax.nn.softmax(q @ jnp.swapaxes(k, -2, -1), axis=-1)
        y = a @ v                                     # (B, H, N, hd)
        y = jnp.transpose(y, (0, 2, 1, 3)).reshape(B, N, C)
        return y @ w_proj.T + b_proj

    q, k, v = split_qkv(x)
    out = attn(q, k, v)
    if x_t is None:
        return out, None, None, None
    qt, kt, vt = split_qkv(x_t)
    return out, attn(qt, kt, vt), attn(qt, k, v), attn(q, kt, vt)


if __name__ == "__main__":
    B, N, C, num_heads = 2, 16, 64, 8

    key = jax.random.PRNGKey(0)
    k_x, k_xt, k_wqkv, k_wp, k_bp = jax.random.split(key, 5)
    x = jax.random.normal(k_x, (B, N, C), dtype=jnp.float32)
    x_t = jax.random.normal(k_xt, (B, N, C), dtype=jnp.float32)
    # Deterministic parameter init (nn.Linear-style uniform ranges).
    w_qkv = jax.random.uniform(k_wqkv, (3 * C, C), jnp.float32,
                               minval=-C ** -0.5, maxval=C ** -0.5)
    w_proj = jax.random.uniform(k_wp, (C, C), jnp.float32,
                                minval=-C ** -0.5, maxval=C ** -0.5)
    b_proj = jax.random.uniform(k_bp, (C,), jnp.float32,
                                minval=-C ** -0.5, maxval=C ** -0.5)

    # Full path (x_t provided): returns (x, x_t, x_ts, x_st).
    outs = attention_forward(x, x_t, w_qkv, w_proj, b_proj, num_heads)
    outs = jax.block_until_ready(outs)

    refs = _reference(x, x_t, w_qkv, w_proj, b_proj, num_heads)
    # bf16 MXU path needs a bf16-level tolerance; f32 path is near-exact.
    tol = 3e-2 if jax.default_backend() == "tpu" else 2e-3
    for o, r in zip(outs, refs):
        assert jnp.allclose(o.astype(jnp.float32), r, atol=tol, rtol=tol), \
            "mismatch vs reference"

    # Self-attention-only path (x_t=None).
    out_single, n1, n2, n3 = attention_forward(x, None, w_qkv, w_proj,
                                               b_proj, num_heads)
    out_single = jax.block_until_ready(out_single)
    assert n1 is None and n2 is None and n3 is None
    assert jnp.allclose(out_single.astype(jnp.float32), refs[0],
                        atol=tol, rtol=tol), "mismatch vs reference (self)"

    print("KERNEL_OK")
</pallas_src>

<mosaic_0001>
module attributes {stable_mosaic.version = 11 : i64} {
  func.func @_attn_pair_kernel(%arg0: i32, %arg1: memref<1x2x16x64xf32, #tpu.memory_space<vmem>>, %arg2: memref<192x64xf32, #tpu.memory_space<vmem>>, %arg3: memref<64x64xf32, #tpu.memory_space<vmem>>, %arg4: memref<1x64xf32, #tpu.memory_space<vmem>>, %arg5: memref<1x4x16x64xf32, #tpu.memory_space<vmem>>) attributes {dimension_semantics = [#tpu.dimension_semantics<parallel>], iteration_bounds = array<i64: 2>, scalar_prefetch = 0 : i64, scratch_operands = 0 : i64, tpu.core_type = #tpu.core_type<tc>, window_params = [{transform_indices = @transform_0, window_bounds = array<i64: 1, 2, 16, 64>}, {pipeline_mode = #tpu.pipeline_mode<synchronous>, transform_indices = @transform_1, window_bounds = array<i64: 192, 64>}, {pipeline_mode = #tpu.pipeline_mode<synchronous>, transform_indices = @transform_2, window_bounds = array<i64: 64, 64>}, {pipeline_mode = #tpu.pipeline_mode<synchronous>, transform_indices = @transform_3, window_bounds = array<i64: 1, 64>}, {transform_indices = @transform_4, window_bounds = array<i64: 1, 4, 16, 64>}]} {
    %c0 = arith.constant 0 : index
    %c0_0 = arith.constant 0 : index
    %c0_1 = arith.constant 0 : index
    %c0_2 = arith.constant 0 : index
    %0 = vector.load %arg1[%c0, %c0_0, %c0_1, %c0_2] : memref<1x2x16x64xf32, #tpu.memory_space<vmem>>, vector<1x2x16x64xf32>
    %1 = vector.shape_cast %0 : vector<1x2x16x64xf32> to vector<2x16x64xf32>
    %2 = vector.shape_cast %1 : vector<2x16x64xf32> to vector<32x64xf32>
    %c0_3 = arith.constant 0 : index
    %c0_4 = arith.constant 0 : index
    %3 = vector.load %arg2[%c0_3, %c0_4] : memref<192x64xf32, #tpu.memory_space<vmem>>, vector<192x64xf32>
    %cst = arith.constant dense<0.000000e+00> : vector<192x32xf32>
    %4 = tpu.matmul %3, %2, %cst {dimension_numbers = #tpu.dot_dimension_numbers<[1], [1], [0], [0], [0, 0, 1, 0], [], []>} : vector<192x64xf32>, vector<32x64xf32>, vector<192x32xf32> -> vector<192x32xf32>
    %5 = vector.shape_cast %4 : vector<192x32xf32> to vector<3x8x8x32xf32>
    %6 = vector.extract_strided_slice %5 {offsets = [0, 0, 0, 0], sizes = [1, 8, 8, 32], strides = [1, 1, 1, 1]} : vector<3x8x8x32xf32> to vector<1x8x8x32xf32>
    %7 = vector.shape_cast %6 : vector<1x8x8x32xf32> to vector<8x8x32xf32>
    %8 = vector.extract_strided_slice %5 {offsets = [1, 0, 0, 0], sizes = [1, 8, 8, 32], strides = [1, 1, 1, 1]} : vector<3x8x8x32xf32> to vector<1x8x8x32xf32>
    %9 = vector.shape_cast %8 : vector<1x8x8x32xf32> to vector<8x8x32xf32>
    %10 = vector.extract_strided_slice %5 {offsets = [2, 0, 0, 0], sizes = [1, 8, 8, 32], strides = [1, 1, 1, 1]} : vector<3x8x8x32xf32> to vector<1x8x8x32xf32>
    %11 = vector.shape_cast %10 : vector<1x8x8x32xf32> to vector<8x8x32xf32>
    %12 = vector.extract_strided_slice %9 {offsets = [0, 0, 0], sizes = [8, 8, 16], strides = [1, 1, 1]} : vector<8x8x32xf32> to vector<8x8x16xf32>
    %13 = vector.extract_strided_slice %9 {offsets = [0, 0, 16], sizes = [8, 8, 16], strides = [1, 1, 1]} : vector<8x8x32xf32> to vector<8x8x16xf32>
    %14 = vector.extract_strided_slice %11 {offsets = [0, 0, 0], sizes = [8, 8, 16], strides = [1, 1, 1]} : vector<8x8x32xf32> to vector<8x8x16xf32>
    %15 = vector.extract_strided_slice %11 {offsets = [0, 0, 16], sizes = [8, 8, 16], strides = [1, 1, 1]} : vector<8x8x32xf32> to vector<8x8x16xf32>
    %cst_5 = arith.constant dense<0.000000e+00> : vector<8x32x16xf32>
    %16 = tpu.matmul %7, %12, %cst_5 {dimension_numbers = #tpu.dot_dimension_numbers<[1], [1], [2], [2], [0, 0, 0, 2, 1, 2], [0], [0]>} : vector<8x8x32xf32>, vector<8x8x16xf32>, vector<8x32x16xf32> -> vector<8x32x16xf32>
    %cst_6 = arith.constant dense<0xFF800000> : vector<8x32xf32>
    %17 = vector.multi_reduction <maximumf>, %16, %cst_6 [2] : vector<8x32x16xf32> to vector<8x32xf32>
    %18 = vector.shape_cast %17 : vector<8x32xf32> to vector<8x32x1xf32>
    %19 = vector.broadcast %18 : vector<8x32x1xf32> to vector<8x32x16xf32>
    %20 = arith.subf %16, %19 : vector<8x32x16xf32>
    %21 = math.exp %20 : vector<8x32x16xf32>
    %cst_7 = arith.constant dense<0.000000e+00> : vector<8x32xf32>
    %22 = vector.multi_reduction <add>, %21, %cst_7 [2] : vector<8x32x16xf32> to vector<8x32xf32>
    %23 = vector.shape_cast %22 : vector<8x32xf32> to vector<8x32x1xf32>
    %24 = tpu.reciprocal %23 {approx = true} : vector<8x32x1xf32> -> vector<8x32x1xf32>
    %25 = vector.broadcast %24 : vector<8x32x1xf32> to vector<8x32x16xf32>
    %26 = arith.mulf %21, %25 : vector<8x32x16xf32>
    %cst_8 = arith.constant dense<0.000000e+00> : vector<8x8x32xf32>
    %27 = tpu.matmul %14, %26, %cst_8 {dimension_numbers = #tpu.dot_dimension_numbers<[2], [2], [1], [1], [0, 0, 0, 1, 1, 1], [0], [0]>} : vector<8x8x16xf32>, vector<8x32x16xf32>, vector<8x8x32xf32> -> vector<8x8x32xf32>
    %28 = vector.shape_cast %27 : vector<8x8x32xf32> to vector<64x32xf32>
    %c0_9 = arith.constant 0 : index
    %c0_10 = arith.constant 0 : index
    %29 = vector.load %arg3[%c0_9, %c0_10] : memref<64x64xf32, #tpu.memory_space<vmem>>, vector<64x64xf32>
    %cst_11 = arith.constant dense<0.000000e+00> : vector<32x64xf32>
    %30 = tpu.matmul %28, %29, %cst_11 {dimension_numbers = #tpu.dot_dimension_numbers<[0], [1], [1], [0], [0, 1, 1, 0], [], []>} : vector<64x32xf32>, vector<64x64xf32>, vector<32x64xf32> -> vector<32x64xf32>
    %c0_12 = arith.constant 0 : index
    %c0_13 = arith.constant 0 : index
    %31 = vector.load %arg4[%c0_12, %c0_13] : memref<1x64xf32, #tpu.memory_space<vmem>>, vector<1x64xf32>
    %32 = vector.broadcast %31 : vector<1x64xf32> to vector<32x64xf32>
    %33 = arith.addf %30, %32 : vector<32x64xf32>
    %cst_14 = arith.constant dense<0.000000e+00> : vector<8x32x16xf32>
    %34 = tpu.matmul %7, %13, %cst_14 {dimension_numbers = #tpu.dot_dimension_numbers<[1], [1], [2], [2], [0, 0, 0, 2, 1, 2], [0], [0]>} : vector<8x8x32xf32>, vector<8x8x16xf32>, vector<8x32x16xf32> -> vector<8x32x16xf32>
    %cst_15 = arith.constant dense<0xFF800000> : vector<8x32xf32>
    %35 = vector.multi_reduction <maximumf>, %34, %cst_15 [2] : vector<8x32x16xf32> to vector<8x32xf32>
    %36 = vector.shape_cast %35 : vector<8x32xf32> to vector<8x32x1xf32>
    %37 = vector.broadcast %36 : vector<8x32x1xf32> to vector<8x32x16xf32>
    %38 = arith.subf %34, %37 : vector<8x32x16xf32>
    %39 = math.exp %38 : vector<8x32x16xf32>
    %cst_16 = arith.constant dense<0.000000e+00> : vector<8x32xf32>
    %40 = vector.multi_reduction <add>, %39, %cst_16 [2] : vector<8x32x16xf32> to vector<8x32xf32>
    %41 = vector.shape_cast %40 : vector<8x32xf32> to vector<8x32x1xf32>
    %42 = tpu.reciprocal %41 {approx = true} : vector<8x32x1xf32> -> vector<8x32x1xf32>
    %43 = vector.broadcast %42 : vector<8x32x1xf32> to vector<8x32x16xf32>
    %44 = arith.mulf %39, %43 : vector<8x32x16xf32>
    %cst_17 = arith.constant dense<0.000000e+00> : vector<8x8x32xf32>
    %45 = tpu.matmul %15, %44, %cst_17 {dimension_numbers = #tpu.dot_dimension_numbers<[2], [2], [1], [1], [0, 0, 0, 1, 1, 1], [0], [0]>} : vector<8x8x16xf32>, vector<8x32x16xf32>, vector<8x8x32xf32> -> vector<8x8x32xf32>
    %46 = vector.shape_cast %45 : vector<8x8x32xf32> to vector<64x32xf32>
    %c0_18 = arith.constant 0 : index
    %c0_19 = arith.constant 0 : index
    %47 = vector.load %arg3[%c0_18, %c0_19] : memref<64x64xf32, #tpu.memory_space<vmem>>, vector<64x64xf32>
    %cst_20 = arith.constant dense<0.000000e+00> : vector<32x64xf32>
    %48 = tpu.matmul %46, %47, %cst_20 {dimension_numbers = #tpu.dot_dimension_numbers<[0], [1], [1], [0], [0, 1, 1, 0], [], []>} : vector<64x32xf32>, vector<64x64xf32>, vector<32x64xf32> -> vector<32x64xf32>
    %c0_21 = arith.constant 0 : index
    %c0_22 = arith.constant 0 : index
    %49 = vector.load %arg4[%c0_21, %c0_22] : memref<1x64xf32, #tpu.memory_space<vmem>>, vector<1x64xf32>
    %50 = vector.broadcast %49 : vector<1x64xf32> to vector<32x64xf32>
    %51 = arith.addf %48, %50 : vector<32x64xf32>
    %52 = vector.extract_strided_slice %33 {offsets = [0, 0], sizes = [16, 64], strides = [1, 1]} : vector<32x64xf32> to vector<16x64xf32>
    %c0_23 = arith.constant 0 : index
    %c0_24 = arith.constant 0 : index
    %c0_25 = arith.constant 0 : index
    %c0_26 = arith.constant 0 : index
    %53 = vector.load %arg5[%c0_23, %c0_24, %c0_25, %c0_26] : memref<1x4x16x64xf32, #tpu.memory_space<vmem>>, vector<1x1x16x64xf32>
    %54 = vector.shape_cast %53 : vector<1x1x16x64xf32> to vector<16x64xf32>
    %55 = vector.shape_cast %52 : vector<16x64xf32> to vector<1x1x16x64xf32>
    tpu.vector_store %arg5[%c0_23, %c0_24, %c0_25, %c0_26], %55 {strides = array<i32>} : memref<1x4x16x64xf32, #tpu.memory_space<vmem>>, vector<1x1x16x64xf32>,
    %56 = vector.extract_strided_slice %51 {offsets = [16, 0], sizes = [16, 64], strides = [1, 1]} : vector<32x64xf32> to vector<16x64xf32>
    %c0_27 = arith.constant 0 : index
    %c1 = arith.constant 1 : index
    %c0_28 = arith.constant 0 : index
    %c0_29 = arith.constant 0 : index
    %57 = vector.load %arg5[%c0_27, %c1, %c0_28, %c0_29] : memref<1x4x16x64xf32, #tpu.memory_space<vmem>>, vector<1x1x16x64xf32>
    %58 = vector.shape_cast %57 : vector<1x1x16x64xf32> to vector<16x64xf32>
    %59 = vector.shape_cast %56 : vector<16x64xf32> to vector<1x1x16x64xf32>
    tpu.vector_store %arg5[%c0_27, %c1, %c0_28, %c0_29], %59 {strides = array<i32>} : memref<1x4x16x64xf32, #tpu.memory_space<vmem>>, vector<1x1x16x64xf32>,
    %60 = vector.extract_strided_slice %33 {offsets = [16, 0], sizes = [16, 64], strides = [1, 1]} : vector<32x64xf32> to vector<16x64xf32>
    %c0_30 = arith.constant 0 : index
    %c2 = arith.constant 2 : index
    %c0_31 = arith.constant 0 : index
    %c0_32 = arith.constant 0 : index
    %61 = vector.load %arg5[%c0_30, %c2, %c0_31, %c0_32] : memref<1x4x16x64xf32, #tpu.memory_space<vmem>>, vector<1x1x16x64xf32>
    %62 = vector.shape_cast %61 : vector<1x1x16x64xf32> to vector<16x64xf32>
    %63 = vector.shape_cast %60 : vector<16x64xf32> to vector<1x1x16x64xf32>
    tpu.vector_store %arg5[%c0_30, %c2, %c0_31, %c0_32], %63 {strides = array<i32>} : memref<1x4x16x64xf32, #tpu.memory_space<vmem>>, vector<1x1x16x64xf32>,
    %64 = vector.extract_strided_slice %51 {offsets = [0, 0], sizes = [16, 64], strides = [1, 1]} : vector<32x64xf32> to vector<16x64xf32>
    %c0_33 = arith.constant 0 : index
    %c3 = arith.constant 3 : index
    %c0_34 = arith.constant 0 : index
    %c0_35 = arith.constant 0 : index
    %65 = vector.load %arg5[%c0_33, %c3, %c0_34, %c0_35] : memref<1x4x16x64xf32, #tpu.memory_space<vmem>>, vector<1x1x16x64xf32>
    %66 = vector.shape_cast %65 : vector<1x1x16x64xf32> to vector<16x64xf32>
    %67 = vector.shape_cast %64 : vector<16x64xf32> to vector<1x1x16x64xf32>
    tpu.vector_store %arg5[%c0_33, %c3, %c0_34, %c0_35], %67 {strides = array<i32>} : memref<1x4x16x64xf32, #tpu.memory_space<vmem>>, vector<1x1x16x64xf32>,
    return
  }
  func.func @transform_0(%arg0: i32) -> (i32, i32, i32, i32) {
    %c0_i32 = arith.constant 0 : i32
    %c0_i32_0 = arith.constant 0 : i32
    %c0_i32_1 = arith.constant 0 : i32
    %c0_i32_2 = arith.constant 0 : i32
    return %arg0, %c0_i32, %c0_i32_0, %c0_i32_1 : i32, i32, i32, i32
  }
  func.func @transform_1(%arg0: i32) -> (i32, i32) {
    %c0_i32 = arith.constant 0 : i32
    %c0_i32_0 = arith.constant 0 : i32
    %c0_i32_1 = arith.constant 0 : i32
    return %c0_i32, %c0_i32_0 : i32, i32
  }
  func.func @transform_2(%arg0: i32) -> (i32, i32) {
    %c0_i32 = arith.constant 0 : i32
    %c0_i32_0 = arith.constant 0 : i32
    %c0_i32_1 = arith.constant 0 : i32
    return %c0_i32, %c0_i32_0 : i32, i32
  }
  func.func @transform_3(%arg0: i32) -> (i32, i32) {
    %c0_i32 = arith.constant 0 : i32
    %c0_i32_0 = arith.constant 0 : i32
    %c0_i32_1 = arith.constant 0 : i32
    return %c0_i32, %c0_i32_0 : i32, i32
  }
  func.func @transform_4(%arg0: i32) -> (i32, i32, i32, i32) {
    %c0_i32 = arith.constant 0 : i32
    %c0_i32_0 = arith.constant 0 : i32
    %c0_i32_1 = arith.constant 0 : i32
    %c0_i32_2 = arith.constant 0 : i32
    return %arg0, %c0_i32, %c0_i32_0, %c0_i32_1 : i32, i32, i32, i32
  }
}

</mosaic_0001>

<bundles_post_ra>
// kernel: tpu_custom_call.1
= control target key start
LH: loop header
LB: loop body
LE: loop exit
PB: predicated region body
PF: predicated region fallthrough
CT: control target
= control target key end

     0   :  { %9 = vsyncpa [#allocation3], 0  ;;  %s7559_s0 = inlined_call_operand.vmem [shape: f32[2,2,16,64], index: 0, kind: input, shape index: {}]   ;;  %s7560_s1 = inlined_call_operand.vmem [shape: f32[192,64], index: 1, kind: input, shape index: {}]   ;;  %s7561_s2 = inlined_call_operand.vmem [shape: f32[64,64], index: 2, kind: input, shape index: {}]   ;;  %s7562_s3 = inlined_call_operand.vmem [shape: f32[1,64], index: 3, kind: input, shape index: {}]   ;;  %s7563_s4 = inlined_call_operand.hbm [shape: f32[2,4,16,64], index: 4, kind: output, shape index: {}]  }
   0x1   :  { %11 = vsyncpa [#allocation3 + $0x1], 0  ;;  %s6102_s15 = smov 0   ;;  %s6104_s16 = smov 0  }
   0x2   :  { %s6106_s17 = smov 0   ;;  %s6108_s18 = smov 0  }
   0x3 LB: > { %s6123_s19 = sadd.s32 4294967295, %s6068_s18   ;;  %s4696_s20 = sadd.s32 4294967294, %s6068_s18   ;;  %s6068_s18 = sphi %s6108_s18, %s7642_s18   ;;  %s6064_s17 = sphi %s6106_s17, %s7641_s17   ;;  %s6060_s16 = sphi %s6104_s16, %s7640_s16   ;;  %s6056_s15 = sphi %s6102_s15, %s7639_s15  }
   0x4   : > { %s6127_s21 = sadd.s32 1, %s6068_s18   ;;  %s113_s22 = sadd.s32 1, %s6064_s17 }
   0x5   : > { %s110_s23 = ssub.s32 %s6068_s18, %s6127_s21  ;;  %p123_p0 = scmp.ne.s32.totalorder %s6064_s17, %s6060_s16 }
   0x6   : > { %p111_p1 = scmp.eq.s32.totalorder %s110_s23, 0  ;;  %p124_p2 = scmp.eq.s32.totalorder %s6123_s19, 1 }
   0x7   : > { %p129_p3 = scmp.ne.s32.totalorder %s6060_s16, %s6056_s15  ;;  %p130_p4 = scmp.eq.s32.totalorder %s4696_s20, 1 }
   0x8   : > { %s6138_s24 = scalar_select %p111_p1, %s6064_s17, %s113_s22  }
   0x9   : > { %p6140_p5 = por %p124_p2, %p123_p0  ;;  %p6144_p6 = por %p130_p4, %p129_p3 }
   0xa   : > { %p4699_p7 = scmp.ge.s32.totalorder %s6068_s18, 1  ;;  %p165_p8 = scmp.lt.s32.totalorder %s6068_s18, 3 }
   0xc   : > { %p166_p9 = pnand %p4699_p7, %p165_p8 }
   0xe   : > { %169 = sbr.rel (%p166_p9) target bundleno = 2537 (0x9e9), region = 36 }
  0x15   : > { %p191_p10 = scmp.lt.s32.totalorder %s6123_s19, 1  ;;  %vm224_vm0 = vcmask 523264   ;;  %v200_v0 = vld [vmem:[%s7560_s1] sm:$0xff]  ;;  %v201_v8 = vld [vmem:[%s7560_s1 + $0x8] sm:$0xff]  ;;  %v202_v9 = vld [vmem:[%s7560_s1 + $0x10] sm:$0xff]  ;;  %vm526_vm2 = vcmask 64512  }
  0x16   : > { %5133 = vmatprep.mubr.msk.f32.mxu0 %vm224_vm0, %v200_v0  ;;  %vm6161_vm1 = vmpackc.low %vm224_vm0, %vm224_vm0  ;;  %v203_v10 = vld [vmem:[%s7560_s1 + $0x18] sm:$0xff]  ;;  %v204_v11 = vld [vmem:[%s7560_s1 + $0x20] sm:$0xff]  ;;  %vm1527_vm3 = vcmask 130048   ;;  %vm6071_vm4 = vmmov 0   ;;  %s6074_s14 = smov [#allocation2]  }
  0x17   : > { %s192_s29 = scalar_select %p191_p10, %s6123_s19, 1  ;;  %v205_v12 = vld [vmem:[%s7560_s1 + $0x28] sm:$0xff]  ;;  %v206_v13 = vld [vmem:[%s7560_s1 + $0x30] sm:$0xff]  ;;  %v207_v14 = vld [vmem:[%s7560_s1 + $0x38] sm:$0xff] }
  0x18   : > { %v208_v15 = vld [vmem:[%s7560_s1 + $0x40] sm:$0xff]  ;;  %v209_v16 = vld [vmem:[%s7560_s1 + $0x48] sm:$0xff]  ;;  %v210_v17 = vld [vmem:[%s7560_s1 + $0x50] sm:$0xff]  ;;  %s6010_s20 = sshll.u32 %s6074_s14, 4  ;;  %s6011_s20 = int_to_ptr.vmem [resolvable:$false] %s6010_s20 }
  0x19   : > { %s4911_s30 = sshll.u32 %s192_s29, 5  ;;  %v211_v18 = vld [vmem:[%s7560_s1 + $0x58] sm:$0xff]  ;;  %v212_v19 = vld [vmem:[%s7560_s1 + $0x60] sm:$0xff]  ;;  %v213_v20 = vld [vmem:[%s7560_s1 + $0x68] sm:$0xff]  ;;  %s6073_s29 = smov 112  }
  0x1a   : > { %s195_s7 = scalar_lea.vmem %s7559_s0, %s4911_s30  ;;  %v214_v21 = vld [vmem:[%s7560_s1 + $0x70] sm:$0xff]  ;;  %v215_v22 = vld [vmem:[%s7560_s1 + $0x78] sm:$0xff]  ;;  %vm6755_vm5 = vmpackc.low %vm1527_vm3, %vm1527_vm3  ;;  %s188_s30 = sand.u32 1, %s6060_s16  }
  0x1b   : > { %v196_v2 = vld [vmem:[%s195_s7] sm:$0xff]  ;;  %v197_v3 = vld [vmem:[%s195_s7 + $0x8] sm:$0xff]  ;;  %v198_v4 = vld [vmem:[%s195_s7 + $0x10] sm:$0xff]  ;;  %s4700_s5 = sshll.u32 %s188_s30, 6  ;;  %s6012_s22 = scalar_lea.vmem %s6011_s20, 2048 }
  0x1c   : > { %v5517_v5 = vpack.c.bf16 %v197_v3, %v196_v2  ;;  %v199_v6 = vld [vmem:[%s195_s7 + $0x18] sm:$0xff]  ;;  %s7219_s8 = scalar_lea.vmem [#allocation2], %s4700_s5 }
  0x1d   : > { %v5523_v7 = vpack.c.bf16 %v199_v6, %v198_v4  ;;  %s4634_s9 = sshll.u32 %s7219_s8, 4  ;;  %s7509_s9 = int_to_ptr.vmem [resolvable:$true] %s4634_s9 }
  0x1e   : > { %5519 = vmatprep.subr.msk.bf16.mxu0 %vm6161_vm1, %v5517_v5  ;;  %s6006_s13 = scalar_lea.vmem %s7509_s9, 1024  ;;  %p6013_p0 = scmp.lt.s32.totalorder %s7509_s9, %s6011_s20 }
  0x1f   : > { %5522 = vmatpush3.bf16.xpose.msk.msra.mxu0 %vm6161_vm1, %v5517_v5  ;;  %p6007_p11 = scmp.ne.s32.totalorder %s7509_s9, %s6006_s13  ;;  %p6014_p1 = scmp.lt.s32.totalorder %s6012_s22, %s6006_s13 }
  0x20   : > { %5525 = vmatprep.subr.msk.bf16.mxu0 %vm6161_vm1, %v5523_v7 }
  0x21   : > { %p6008_p12 = pnand %p6007_p11, %p6140_p5  ;;  %p6015_p2 = por %p6014_p1, %p6013_p0 }
  0x23   : > { %p6009_p13 = pneg %p6008_p12 }
  0x25   : > { %p6016_p3 = pnand %p6015_p2, %p6009_p13 }
  0x27   : > { %5528 = vmatpush3.bf16.xpose.msk.msra.mxu0 %vm6161_vm1, %v5523_v7 }
  0x2e   : > { %5134 = vmatmul.mubr.msk.f32.vlgmr.msra.gmra.mrb[0].mxu0 %vm224_vm0, %v201_v8  ;;  %v216_v8 = vld [vmem:[%s7560_s1 + $0x80] sm:$0xff] }
  0x2f   : > { %5136 = vmatprep.mubr.msk.f32.mxu0 %vm224_vm0, %v202_v9  ;;  %v217_v9 = vld [vmem:[%s7560_s1 + $0x88] sm:$0xff] }
  0x32   : > { %5137 = vmatmul.mubr.msk.f32.gmra.mrb[2].mxu0 %vm224_vm0, %v203_v10 }
  0x33   : > { %5139 = vmatprep.mubr.msk.f32.mxu0 %vm224_vm0, %v204_v11 }
  0x36   : > { %5140 = vmatmul.mubr.msk.f32.gmra.mrb[4].mxu0 %vm224_vm0, %v205_v12 }
  0x37   : > { %5142 = vmatprep.mubr.msk.f32.mxu0 %vm224_vm0, %v206_v13 }
  0x3a   : > { %5143 = vmatmul.mubr.msk.f32.gmra.mrb[6].mxu0 %vm224_vm0, %v207_v14 }
  0x3b   : > { %5145 = vmatprep.mubr.msk.f32.mxu0 %vm224_vm0, %v208_v15 }
  0x3e   : > { %5146 = vmatmul.mubr.msk.f32.gmra.mrb[8].mxu0 %vm224_vm0, %v209_v16 }
  0x3f   : > { %5148 = vmatprep.mubr.msk.f32.mxu0 %vm224_vm0, %v210_v17 }
  0x42   : > { %5149 = vmatmul.mubr.msk.f32.gmra.mrb[10].mxu0 %vm224_vm0, %v211_v18 }
  0x43   : > { %5151 = vmatprep.mubr.msk.f32.mxu0 %vm224_vm0, %v212_v19 }
  0x46   : > { %5152 = vmatmul.mubr.msk.f32.gmra.mrb[12].mxu0 %vm224_vm0, %v213_v20 }
  0x47   : > { %5154 = vmatprep.mubr.msk.f32.mxu0 %vm224_vm0, %v214_v21 }
  0x4a   : > { %5155 = vmatmul.mubr.msk.f32.gmra.mrb[14].mxu0 %vm224_vm0, %v215_v22  ;;  %v218_v22 = vld [vmem:[%s7560_s1 + $0x90] sm:$0xff] }
  0x4b   : > { %5157 = vmatprep.mubr.msk.f32.mxu0 %vm224_vm0, %v216_v8 }
  0x4e   : > { %5158 = vmatmul.mubr.msk.f32.gmra.mrb[16].mxu0 %vm224_vm0, %v217_v9 }
  0x4f   : > { %5160 = vmatprep.mubr.msk.f32.mxu0 %vm224_vm0, %v218_v22 }
 0x101   : > { %v5135_v23 = vpop.f32.mrb[0].mxu0 }
 0x102   : > { %v375_v24 = vpop.f32.mrb[1].mxu0 }
 0x103   : > { %494 = vxpose.xlu0.b32.start.end [1/1] (short) (narrow) %v375_v24, 32  ;;  %v219_v24 = vld [vmem:[%s7560_s1 + $0x98] sm:$0xff] }
 0x104   : > { %5161 = vmatmul.mubr.msk.f32.gmra.mrb[18].mxu0 %vm224_vm0, %v219_v24  ;;  %v221_v24 = vld [vmem:[%s7560_s1 + $0xa8] sm:$0xff] }
 0x105   : > { %v5138_v25 = vpop.f32.mrb[2].mxu0 }
 0x106   : > { %v385_v26 = vpop.f32.mrb[3].mxu0 }
 0x107   : > { %753 = vxpose.xlu1.b32.start.end [1/1] (short) (narrow) %v385_v26, 32 }
 0x109   : > { %v5141_v27 = vpop.f32.mrb[4].mxu0 }
 0x10a   : > { %v395_v28 = vpop.f32.mrb[5].mxu0 }
 0x10d   : > { %v5144_v29 = vpop.f32.mrb[6].mxu0 }
 0x10e   : > { %v405_v30 = vpop.f32.mrb[7].mxu0 }
 0x110   : > { %624 = vxpose.xlu0.b32.start.end [1/1] (short) (narrow) %v5135_v23, 32 }
 0x111   : > { %v6233_v31 = vpop.f32.mrb[8].mxu0 }
 0x112   : > { %v6235_v32 = vpop.f32.mrb[9].mxu0 }
 0x113   : > { %5169 = vmatprep.subr.mxu1 %v6235_v32 }
 0x114   : > { %882 = vxpose.xlu1.b32.start.end [1/1] (short) (narrow) %v5138_v25, 32  ;;  %5170 = vmatpush3.msra.mxu1 %v6235_v32 }
 0x115   : > { %5177 = vmatprep.subr.mxu1 %v6233_v31  ;;  %v6240_v33 = vpop.f32.mrb[10].mxu0 }
 0x116   : > { %v6242_v34 = vpop.f32.mrb[11].mxu0 }
 0x119   : > { %v6244_v35 = vpop.f32.mrb[12].mxu0 }
 0x11a   : > { %v6246_v36 = vpop.f32.mrb[13].mxu0 }
 0x11d   : > { %1011 = vxpose.xlu0.b32.start.end [1/1] (short) (narrow) %v395_v28, 32  ;;  %v6248_v37 = vpop.f32.mrb[14].mxu0 }
 0x11e   : > { %v6250_v38 = vpop.f32.mrb[15].mxu0 }
 0x121   : > { %1140 = vxpose.xlu1.b32.start.end [1/1] (short) (narrow) %v5141_v27, 32 }
 0x12a   : > { %1269 = vxpose.xlu0.b32.start.end [1/1] (short) (narrow) %v405_v30, 32 }
 0x12e   : > { %1398 = vxpose.xlu1.b32.start.end [1/1] (short) (narrow) %v5144_v29, 32 }
 0x183   : > { %v6252_v39 = vpop.trf.xlu0 }
 0x184   : > { %5171 = vmatprep.mubr.msk.f32.mxu1 %vm526_vm2, %v6252_v39 }
 0x187   : > { %v6256_v40 = vpop.trf.xlu0  ;;  %v6258_v41 = vpop.trf.xlu1 }
 0x188   : > { %5172 = vmatmul.mubr.msk.f32.vlgmr.msra.gmra.mrb[0].mxu1 %vm526_vm2, %v6256_v40 }
 0x189   : > { %5178 = vmatpush3.msra.mxu1 %v6233_v31 }
 0x18a   : > { %5185 = vmatprep.subr.mxu1 %v6242_v34 }
 0x18b   : > { %v6264_v42 = vpop.trf.xlu0  ;;  %v6266_v43 = vpop.trf.xlu1 }
 0x18c   : > { %5174 = vmatprep.mubr.msk.f32.mxu1 %vm526_vm2, %v6264_v42 }
 0x18f   : > { %v6270_v44 = vpop.trf.xlu0  ;;  %v6272_v45 = vpop.trf.xlu1 }
 0x190   : > { %7592 = vst [vmem:[#allocation5_spill] sm:$0xff] %v6272_v45  ;;  %5175 = vmatmul.mubr.msk.f32.gmra.mrb[2].mxu1 %vm526_vm2, %v6270_v44 }
 0x193   : > { %v6276_v46 = vpop.trf.xlu0  ;;  %v6278_v47 = vpop.trf.xlu1 }
 0x194   : > { %7593 = vst [vmem:[#allocation6_spill] sm:$0xff] %v6278_v47  ;;  %5179 = vmatprep.mubr.msk.f32.mxu1 %vm526_vm2, %v6276_v46 }
 0x197   : > { %v6282_v48 = vpop.trf.xlu0  ;;  %v6284_v49 = vpop.trf.xlu1 }
 0x198   : > { %7594 = vst [vmem:[#allocation7_spill] sm:$0xff] %v6284_v49  ;;  %5180 = vmatmul.mubr.msk.f32.vlgmr.msra.gmra.mrb[4].mxu1 %vm526_vm2, %v6282_v48 }
 0x199   : > { %5186 = vmatpush3.msra.mxu1 %v6242_v34 }
 0x19a   : > { %5193 = vmatprep.subr.mxu1 %v6240_v33 }
 0x19b   : > { %v6290_v50 = vpop.trf.xlu0  ;;  %v6292_v51 = vpop.trf.xlu1 }
 0x19c   : > { %7595 = vst [vmem:[#allocation8_spill] sm:$0xff] %v6292_v51  ;;  %5182 = vmatprep.mubr.msk.f32.mxu1 %vm526_vm2, %v6290_v50 }
 0x19f   : > { %v6296_v52 = vpop.trf.xlu0  ;;  %v6298_v53 = vpop.trf.xlu1 }
 0x1a0   : > { %7596 = vst [vmem:[#allocation9_spill] sm:$0xff] %v6298_v53  ;;  %5183 = vmatmul.mubr.msk.f32.gmra.mrb[6].mxu1 %vm526_vm2, %v6296_v52 }
 0x1a1   : > { %5187 = vmatprep.mubr.msk.f32.mxu1 %vm526_vm2, %v6258_v41 }
 0x1a3   : > { %v6304_v54 = vpop.trf.xlu0  ;;  %v6306_v55 = vpop.trf.xlu1 }
 0x1a4   : > { %7597 = vst [vmem:[#allocation10_spill] sm:$0xff] %v6304_v54  ;;  %7598 = vst [vmem:[#allocation11_spill] sm:$0xff] %v6306_v55  ;;  %5188 = vmatmul.mubr.msk.f32.vlgmr.msra.gmra.mrb[8].mxu1 %vm526_vm2, %v6266_v43 }
 0x1a5   : > { %5194 = vmatpush3.msra.mxu1 %v6240_v33  ;;  %5190 = vmatprep.mubr.msk.f32.mxu1 %vm526_vm2, %v6272_v45 }
 0x1a6   : > { %5201 = vmatprep.subr.mxu1 %v6246_v36 }
 0x1a7   : > { %v6314_v56 = vpop.trf.xlu0  ;;  %v6316_v57 = vpop.trf.xlu1 }
 0x1a8   : > { %7599 = vst [vmem:[#allocation12_spill] sm:$0xff] %v6314_v56  ;;  %7600 = vst [vmem:[#allocation13_spill] sm:$0xff] %v6316_v57  ;;  %5191 = vmatmul.mubr.msk.f32.gmra.mrb[10].mxu1 %vm526_vm2, %v6278_v47 }
 0x1a9   : > { %5195 = vmatprep.mubr.msk.f32.mxu1 %vm526_vm2, %v6284_v49 }
 0x1ab   : > { %v6322_v58 = vpop.trf.xlu0  ;;  %v6324_v59 = vpop.trf.xlu1 }
 0x1ac   : > { %7601 = vst [vmem:[#allocation14_spill] sm:$0xff] %v6322_v58  ;;  %7602 = vst [vmem:[#allocation15_spill] sm:$0xff] %v6324_v59  ;;  %5196 = vmatmul.mubr.msk.f32.vlgmr.msra.gmra.mrb[12].mxu1 %vm526_vm2, %v6292_v51 }
 0x1ad   : > { %5198 = vmatprep.mubr.msk.f32.mxu1 %vm526_vm2, %v6298_v53  ;;  %5202 = vmatpush3.msra.mxu1 %v6246_v36 }
 0x1ae   : > { %5209 = vmatprep.subr.mxu1 %v6244_v35 }
 0x1af   : > { %v6332_v60 = vpop.trf.xlu0  ;;  %v6338_v61 = vpop.trf.xlu1 }
 0x1b0   : > { %7603 = vst [vmem:[#allocation16_spill] sm:$0xff] %v6332_v60  ;;  %5199 = vmatmul.mubr.msk.f32.gmra.mrb[14].mxu1 %vm526_vm2, %v6306_v55  ;;  %7604 = vst [vmem:[#allocation17_spill] sm:$0xff] %v6338_v61 }
 0x1b1   : > { %5203 = vmatprep.mubr.msk.f32.mxu1 %vm526_vm2, %v6304_v54 }
 0x1b3   : > { %v6340_v62 = vpop.trf.xlu0  ;;  %v6348_v63 = vpop.trf.xlu1 }
 0x1b4   : > { %7605 = vst [vmem:[#allocation18_spill] sm:$0xff] %v6340_v62  ;;  %5204 = vmatmul.mubr.msk.f32.vlgmr.msra.gmra.mrb[16].mxu1 %vm526_vm2, %v6314_v56  ;;  %7606 = vst [vmem:[#allocation19_spill] sm:$0xff] %v6348_v63 }
 0x1b5   : > { %5206 = vmatprep.mubr.msk.f32.mxu1 %vm526_vm2, %v6322_v58  ;;  %5210 = vmatpush3.msra.mxu1 %v6244_v35 }
 0x1b6   : > { %5217 = vmatprep.subr.mxu1 %v6250_v38 }
 0x1b7   : > { %v6354_v0 = vpop.trf.xlu0  ;;  %v6356_v2 = vpop.trf.xlu1 }
 0x1b8   : > { %5207 = vmatmul.mubr.msk.f32.gmra.mrb[18].mxu1 %vm526_vm2, %v6332_v60  ;;  %7607 = vst [vmem:[#allocation20_spill] sm:$0xff] %v6354_v0  ;;  %7608 = vst [vmem:[#allocation21_spill] sm:$0xff] %v6356_v2 }
 0x1b9   : > { %5211 = vmatprep.mubr.msk.f32.mxu1 %vm526_vm2, %v6316_v57 }
 0x1bb   : > { %v6364_v3 = vpop.trf.xlu0  ;;  %v6370_v4 = vpop.trf.xlu1 }
 0x1bc   : > { %5212 = vmatmul.mubr.msk.f32.vlgmr.msra.gmra.mrb[20].mxu1 %vm526_vm2, %v6324_v59  ;;  %7609 = vst [vmem:[#allocation22_spill] sm:$0xff] %v6364_v3  ;;  %7610 = vst [vmem:[#allocation23_spill] sm:$0xff] %v6370_v4 }
 0x1bd   : > { %5214 = vmatprep.mubr.msk.f32.mxu1 %vm526_vm2, %v6338_v61  ;;  %5218 = vmatpush3.msra.mxu1 %v6250_v38 }
 0x1be   : > { %5225 = vmatprep.subr.mxu1 %v6248_v37 }
 0x1bf   : > { %v6374_v5 = vpop.trf.xlu0  ;;  %v6379_v6 = vpop.trf.xlu1 }
 0x1c0   : > { %5215 = vmatmul.mubr.msk.f32.gmra.mrb[22].mxu1 %vm526_vm2, %v6348_v63  ;;  %7611 = vst [vmem:[#allocation24_spill] sm:$0xff] %v6374_v5  ;;  %7612 = vst [vmem:[#allocation25_spill] sm:$0xff] %v6379_v6 }
 0x1c1   : > { %5219 = vmatprep.mubr.msk.f32.mxu1 %vm526_vm2, %v6340_v62  ;;  %v222_v62 = vld [vmem:[%s7560_s1 + $0xb0] sm:$0xff] }
 0x1c3   : > { %v6387_v7 = vpop.trf.xlu1 }
 0x1c4   : > { %5220 = vmatmul.mubr.msk.f32.vlgmr.msra.gmra.mrb[24].mxu1 %vm526_vm2, %v6354_v0  ;;  %7613 = vst [vmem:[#allocation26_spill] sm:$0xff] %v6387_v7 }
 0x1c5   : > { %5222 = vmatprep.mubr.msk.f32.mxu1 %vm526_vm2, %v6364_v3  ;;  %5226 = vmatpush3.msra.mxu1 %v6248_v37 }
 0x1c8   : > { %5223 = vmatmul.mubr.msk.f32.gmra.mrb[26].mxu1 %vm526_vm2, %v6374_v5 }
 0x1c9   : > { %5227 = vmatprep.mubr.msk.f32.mxu1 %vm526_vm2, %v6356_v2 }
 0x1cc   : > { %5228 = vmatmul.mubr.msk.f32.vlgmr.msra.gmra.mrb[28].mxu1 %vm526_vm2, %v6370_v4 }
 0x1cd   : > { %5230 = vmatprep.mubr.msk.f32.mxu1 %vm526_vm2, %v6379_v6 }
 0x1d0   : > { %5231 = vmatmul.mubr.msk.f32.gmra.mrb[30].mxu1 %vm526_vm2, %v6387_v7 }
 0x25b   : > { %v6401_v10 = vpop.f32.mrb[0].mxu1 }
 0x25c   : > { %v6403_v11 = vpop.f32.mrb[1].mxu1  ;;  %v1531_v12 = vsel %vm1527_vm3, %v6401_v10, -inf }
 0x25d   : > { %1532 = vmax.xlane.f32.xlu1 %v1531_v12  ;;  %v1528_v13 = vsel %vm1527_vm3, %v6403_v11, -inf }
 0x25e   : > { %1529 = vmax.xlane.f32.xlu0 %v1528_v13 }
 0x263   : > { %v6409_v14 = vpop.f32.mrb[2].mxu1 }
 0x264   : > { %v6411_v15 = vpop.f32.mrb[3].mxu1  ;;  %v1537_v17 = vsel %vm1527_vm3, %v6409_v14, -inf }
 0x265   : > { %v1534_v16 = vsel %vm1527_vm3, %v6411_v15, -inf }
 0x266   : > { %1535 = vmax.xlane.f32.xlu1 %v1534_v16 }
 0x26a   : > { %1538 = vmax.xlane.f32.xlu1 %v1537_v17 }
 0x26b   : > { %v6417_v18 = vpop.f32.mrb[4].mxu1 }
 0x26c   : > { %v6419_v19 = vpop.f32.mrb[5].mxu1  ;;  %v1543_v20 = vsel %vm1527_vm3, %v6417_v18, -inf }
 0x26d   : > { %v1540_v21 = vsel %vm1527_vm3, %v6419_v19, -inf }
 0x26e   : > { %1544 = vmax.xlane.f32.xlu1 %v1543_v20  ;;  %1541 = vmax.xlane.f32.xlu0 %v1540_v21  ;;  %v220_v21 = vld [vmem:[%s7560_s1 + $0xa0] sm:$0xff] }
 0x26f   : > { %5163 = vmatprep.mubr.msk.f32.mxu0 %vm224_vm0, %v220_v21 }
 0x270   : > { %5164 = vmatmul.mubr.msk.f32.gmra.mrb[20].mxu0 %vm224_vm0, %v221_v24 }
 0x271   : > { %5166 = vmatprep.mubr.msk.f32.mxu0 %vm224_vm0, %v222_v62 }
 0x273   : > { %v6429_v23 = vpop.f32.mrb[6].mxu1 }
 0x274   : > { %v6434_v25 = vpop.f32.mrb[7].mxu1  ;;  %v1549_v26 = vsel %vm1527_vm3, %v6429_v23, -inf }
 0x275   : > { %1550 = vmax.xlane.f32.xlu1 %v1549_v26  ;;  %v1546_v27 = vsel %vm1527_vm3, %v6434_v25, -inf }
 0x276   : > { %1547 = vmax.xlane.f32.xlu0 %v1546_v27 }
 0x277   : > { %v6441_v28 = vpop.f32.mrb[8].mxu1 }
 0x278   : > { %v6443_v29 = vpop.f32.mrb[9].mxu1  ;;  %v1555_v30 = vsel %vm1527_vm3, %v6441_v28, -inf }
 0x279   : > { %1556 = vmax.xlane.f32.xlu1 %v1555_v30  ;;  %v1552_v8 = vsel %vm1527_vm3, %v6443_v29, -inf }
 0x27a   : > { %1553 = vmax.xlane.f32.xlu0 %v1552_v8 }
 0x27b   : > { %v6449_v9 = vpop.f32.mrb[10].mxu1 }
 0x27c   : > { %v6451_v12 = vpop.f32.mrb[11].mxu1  ;;  %v1561_v26 = vsel %vm1527_vm3, %v6449_v9, -inf }
 0x27d   : > { %v1558_v30 = vsel %vm1527_vm3, %v6451_v12, -inf }
 0x27f   : > { %v6453_v13 = vpop.f32.mrb[12].mxu1 }
 0x280   : > { %v6455_v16 = vpop.f32.mrb[13].mxu1  ;;  %v1567_v17 = vsel %vm1527_vm3, %v6453_v13, -inf }
 0x281   : > { %1568 = vmax.xlane.f32.xlu1 %v1567_v17  ;;  %v1564_v20 = vsel %vm1527_vm3, %v6455_v16, -inf }
 0x282   : > { %1565 = vmax.xlane.f32.xlu0 %v1564_v20 }
 0x283   : > { %v6464_v22 = vpop.f32.mrb[14].mxu1 }
 0x284   : > { %v6472_v27 = vpop.f32.mrb[15].mxu1  ;;  %v1573_v17 = vsel %vm1527_vm3, %v6464_v22, -inf }
 0x285   : > { %1562 = vmax.xlane.f32.xlu1 %v1561_v26  ;;  %v1570_v21 = vsel %vm1527_vm3, %v6472_v27, -inf }
 0x286   : > { %1559 = vmax.xlane.f32.xlu0 %v1558_v30 }
 0x287   : > { %v6477_v8 = vpop.f32.mrb[16].mxu1 }
 0x288   : > { %v6481_v20 = vpop.f32.mrb[17].mxu1  ;;  %v1579_v24 = vsel %vm1527_vm3, %v6477_v8, -inf }
 0x289   : > { %1574 = vmax.xlane.f32.xlu1 %v1573_v17  ;;  %v1576_v30 = vsel %vm1527_vm3, %v6481_v20, -inf }
 0x28a   : > { %1571 = vmax.xlane.f32.xlu0 %v1570_v21 }
 0x28b   : > { %v6485_v5 = vpop.f32.mrb[18].mxu1 }
 0x28c   : > { %v6489_v26 = vpop.f32.mrb[19].mxu1 }
 0x28d   : > { %1580 = vmax.xlane.f32.xlu1 %v1579_v24  ;;  %v223_v24 = vld [vmem:[%s7560_s1 + $0xb8] sm:$0xff]  ;;  %v1582_v58 = vsel %vm1527_vm3, %v6489_v26, -inf }
 0x28e   : > { %1577 = vmax.xlane.f32.xlu0 %v1576_v30  ;;  %5167 = vmatmul.mubr.msk.f32.gmra.mrb[22].mxu0 %vm224_vm0, %v223_v24 }
 0x28f   : > { %v6493_v3 = vpop.f32.mrb[20].mxu1 }
 0x290   : > { %v6495_v0 = vpop.f32.mrb[21].mxu1  ;;  %v1591_v17 = vsel %vm1527_vm3, %v6493_v3, -inf }
 0x291   : > { %1592 = vmax.xlane.f32.xlu1 %v1591_v17  ;;  %v1588_v21 = vsel %vm1527_vm3, %v6495_v0, -inf  ;;  %v1585_v17 = vsel %vm1527_vm3, %v6485_v5, -inf }
 0x292   : > { %1589 = vmax.xlane.f32.xlu0 %v1588_v21 }
 0x293   : > { %v6508_v30 = vpop.f32.mrb[22].mxu1 }
 0x294   : > { %v6513_v60 = vpop.f32.mrb[23].mxu1  ;;  %v1597_v62 = vsel %vm1527_vm3, %v6508_v30, -inf }
 0x295   : > { %1586 = vmax.xlane.f32.xlu1 %v1585_v17  ;;  %v1594_v24 = vsel %vm1527_vm3, %v6513_v60, -inf }
 0x296   : > { %1583 = vmax.xlane.f32.xlu0 %v1582_v58 }
 0x297   : > { %v6517_v21 = vpop.f32.mrb[24].mxu1 }
 0x298   : > { %v6521_v56 = vpop.f32.mrb[25].mxu1  ;;  %v1603_v17 = vsel %vm1527_vm3, %v6517_v21, -inf }
 0x299   : > { %1598 = vmax.xlane.f32.xlu1 %v1597_v62  ;;  %v1600_v58 = vsel %vm1527_vm3, %v6521_v56, -inf }
 0x29a   : > { %1595 = vmax.xlane.f32.xlu0 %v1594_v24 }
 0x29b   : > { %v6525_v54 = vpop.f32.mrb[26].mxu1 }
 0x29c   : > { %v6529_v7 = vpop.f32.mrb[27].mxu1 }
 0x29d   : > { %1604 = vmax.xlane.f32.xlu1 %v1603_v17  ;;  %v1609_v17 = vsel %vm1527_vm3, %v6525_v54, -inf }
 0x29e   : > { %1601 = vmax.xlane.f32.xlu0 %v1600_v58  ;;  %v1606_v58 = vsel %vm1527_vm3, %v6529_v7, -inf }
 0x29f   : > { %v6533_v6 = vpop.f32.mrb[28].mxu1 }
 0x2a0   : > { %v6535_v4 = vpop.f32.mrb[29].mxu1  ;;  %v1615_v62 = vsel %vm1527_vm3, %v6533_v6, -inf }
 0x2a1   : > { %1616 = vmax.xlane.f32.xlu1 %v1615_v62  ;;  %v1612_v24 = vsel %vm1527_vm3, %v6535_v4, -inf }
 0x2a2   : > { %1613 = vmax.xlane.f32.xlu0 %v1612_v24 }
 0x2a3   : > { %v6541_v2 = vpop.f32.mrb[30].mxu1 }
 0x2a4   : > { %v6545_v63 = vpop.f32.mrb[31].mxu1  ;;  %v1621_v61 = vsel %vm1527_vm3, %v6541_v2, -inf }
 0x2a5   : > { %1610 = vmax.xlane.f32.xlu1 %v1609_v17  ;;  %v1618_v62 = vsel %vm1527_vm3, %v6545_v63, -inf }
 0x2a6   : > { %1607 = vmax.xlane.f32.xlu0 %v1606_v58 }
 0x2a9   : > { %1622 = vmax.xlane.f32.xlu1 %v1621_v61 }
 0x2aa   : > { %1619 = vmax.xlane.f32.xlu0 %v1618_v62 }
 0x2ea   : > { %v1533_v24 = vpop.xlane.xlu1 %1532 }
 0x2eb   : > { %v1625_v59 = vsub.f32 %v6401_v10, %v1533_v24  ;;  %v1530_v57 = vpop.xlane.xlu0 %1529 }
 0x2ec   : > { %v1624_v55 = vsub.f32 %v6403_v11, %v1530_v57 }
 0x2ed   : > { %v1658_v53 = vmul.f32 1.442695, %v1625_v59 }
 0x2ee   : > { %v1656_v17 = vmul.f32 1.442695, %v1624_v55 }
 0x2ef   : > { %5750 = vpow2.f32 %v1658_v53 }
 0x2f0   : > { %5752 = vpow2.f32 %v1656_v17 }
 0x2f3   : > { %v1536_v51 = vpop.xlane.xlu1 %1535 }
 0x2f4   : > { %v1626_v58 = vsub.f32 %v6411_v15, %v1536_v51 }
 0x2f6   : > { %v1660_v49 = vmul.f32 1.442695, %v1626_v58 }
 0x2f7   : > { %v1539_v47 = vpop.xlane.xlu1 %1538 }
 0x2f8   : > { %5754 = vpow2.f32 %v1660_v49  ;;  %v1627_v45 = vsub.f32 %v6409_v14, %v1539_v47 }
 0x2f9   : > { %v6557_v61 = vpop.eup %5750 }
 0x2fa   : > { %v6559_v62 = vpop.eup %5752  ;;  %v1662_v10 = vmul.f32 1.442695, %v1627_v45  ;;  %v1723_v57 = vsel %vm1527_vm3, %v6557_v61, 0.0 }
 0x2fb   : > { %v1545_v59 = vpop.xlane.xlu1 %1544  ;;  %v1542_v55 = vpop.xlane.xlu0 %1541  ;;  %1724 = vadd.xlane.f32.xlu1 %v1723_v57  ;;  %v1720_v53 = vsel %vm1527_vm3, %v6559_v62, 0.0 }
 0x2fc   : > { %5756 = vpow2.f32 %v1662_v10  ;;  %v1629_v51 = vsub.f32 %v6417_v18, %v1545_v59  ;;  %v1628_v49 = vsub.f32 %v6419_v19, %v1542_v55  ;;  %1721 = vadd.xlane.f32.xlu0 %v1720_v53 }
 0x2fe   : > { %v1666_v47 = vmul.f32 1.442695, %v1629_v51  ;;  %v1664_v11 = vmul.f32 1.442695, %v1628_v49 }
 0x300   : > { %5758 = vpow2.f32 %v1666_v47 }
 0x301   : > { %5760 = vpow2.f32 %v1664_v11 }
 0x302   : > { %v6567_v45 = vpop.eup %5754  ;;  %v1551_v14 = vpop.xlane.xlu1 %1550 }
 0x303   : > { %v1631_v15 = vsub.f32 %v6429_v23, %v1551_v14  ;;  %v1548_v24 = vpop.xlane.xlu0 %1547  ;;  %v1726_v17 = vsel %vm1527_vm3, %v6567_v45, 0.0 }
 0x304   : > { %v1630_v58 = vsub.f32 %v6434_v25, %v1548_v24  ;;  %1727 = vadd.xlane.f32.xlu0 %v1726_v17 }
 0x305   : > { %v1670_v18 = vmul.f32 1.442695, %v1631_v15 }
 0x306   : > { %v6573_v10 = vpop.eup %5756  ;;  %v1668_v19 = vmul.f32 1.442695, %v1630_v58  ;;  %v1557_v57 = vpop.xlane.xlu1 %1556 }
 0x307   : > { %5762 = vpow2.f32 %v1670_v18  ;;  %v1633_v59 = vsub.f32 %v6441_v28, %v1557_v57  ;;  %v1554_v55 = vpop.xlane.xlu0 %1553  ;;  %v1729_v53 = vsel %vm1527_vm3, %v6573_v10, 0.0 }
 0x308   : > { %5764 = vpow2.f32 %v1668_v19  ;;  %v1632_v23 = vsub.f32 %v6443_v29, %v1554_v55  ;;  %1730 = vadd.xlane.f32.xlu1 %v1729_v53 }
 0x309   : > { %v1674_v51 = vmul.f32 1.442695, %v1633_v59 }
 0x30a   : > { %v6579_v49 = vpop.eup %5758  ;;  %v1672_v25 = vmul.f32 1.442695, %v1632_v23 }
 0x30b   : > { %v6581_v47 = vpop.eup %5760  ;;  %5766 = vpow2.f32 %v1674_v51  ;;  %v1735_v11 = vsel %vm1527_vm3, %v6579_v49, 0.0 }
 0x30c   : > { %5768 = vpow2.f32 %v1672_v25  ;;  %1736 = vadd.xlane.f32.xlu1 %v1735_v11  ;;  %v1732_v28 = vsel %vm1527_vm3, %v6581_v47, 0.0 }
 0x30d   : > { %1733 = vadd.xlane.f32.xlu0 %v1732_v28 }
 0x30e   : > { %v1569_v14 = vpop.xlane.xlu1 %1568 }
 0x30f   : > { %v1637_v29 = vsub.f32 %v6453_v13, %v1569_v14  ;;  %v1566_v15 = vpop.xlane.xlu0 %1565 }
 0x310   : > { %v1636_v24 = vsub.f32 %v6455_v16, %v1566_v15 }
 0x311   : > { %v6589_v17 = vpop.eup %5762  ;;  %v1682_v58 = vmul.f32 1.442695, %v1637_v29 }
 0x312   : > { %v6591_v18 = vpop.eup %5764  ;;  %v1680_v19 = vmul.f32 1.442695, %v1636_v24  ;;  %v1563_v57 = vpop.xlane.xlu1 %1562  ;;  %v1741_v59 = vsel %vm1527_vm3, %v6589_v17, 0.0 }
 0x313   : > { %5770 = vpow2.f32 %v1682_v58  ;;  %v1635_v55 = vsub.f32 %v6449_v9, %v1563_v57  ;;  %v1560_v53 = vpop.xlane.xlu0 %1559  ;;  %1742 = vadd.xlane.f32.xlu1 %v1741_v59  ;;  %v1738_v13 = vsel %vm1527_vm3, %v6591_v18, 0.0  ;;  %v6070_v58 = vmov 0.0|0.0  }
 0x314   : > { %5772 = vpow2.f32 %v1680_v19  ;;  %v1634_v16 = vsub.f32 %v6451_v12, %v1560_v53  ;;  %1739 = vadd.xlane.f32.xlu0 %v1738_v13  ;;  %5529 = vmatprep.subr.bf16.mxu1 %v6070_v58 }
 0x315   : > { %v6599_v23 = vpop.eup %5766  ;;  %v1678_v51 = vmul.f32 1.442695, %v1635_v55  ;;  %5545 = vmatprep.subr.bf16.mxu0 %v6070_v58 }
 0x316   : > { %v6601_v25 = vpop.eup %5768  ;;  %v1676_v11 = vmul.f32 1.442695, %v1634_v16  ;;  %v1575_v28 = vpop.xlane.xlu1 %1574  ;;  %v1747_v14 = vsel %vm1527_vm3, %v6599_v23, 0.0 }
 0x317   : > { %5774 = vpow2.f32 %v1678_v51  ;;  %v1639_v9 = vsub.f32 %v6464_v22, %v1575_v28  ;;  %v1572_v29 = vpop.xlane.xlu0 %1571  ;;  %1748 = vadd.xlane.f32.xlu1 %v1747_v14  ;;  %v1744_v15 = vsel %vm1527_vm3, %v6601_v25, 0.0 }
 0x318   : > { %5776 = vpow2.f32 %v1676_v11  ;;  %v1638_v12 = vsub.f32 %v6472_v27, %v1572_v29  ;;  %1745 = vadd.xlane.f32.xlu0 %v1744_v15 }
 0x319   : > { %v1686_v24 = vmul.f32 1.442695, %v1639_v9 }
 0x31a   : > { %v1684_v19 = vmul.f32 1.442695, %v1638_v12  ;;  %v1581_v57 = vpop.xlane.xlu1 %1580 }
 0x31b   : > { %5778 = vpow2.f32 %v1686_v24  ;;  %v1641_v22 = vsub.f32 %v6477_v8, %v1581_v57  ;;  %v1578_v59 = vpop.xlane.xlu0 %1577 }
 0x31c   : > { %5780 = vpow2.f32 %v1684_v19  ;;  %v1640_v55 = vsub.f32 %v6481_v20, %v1578_v59 }
 0x31d   : > { %v6613_v53 = vpop.eup %5770  ;;  %v1690_v13 = vmul.f32 1.442695, %v1641_v22 }
 0x31e   : > { %v6615_v27 = vpop.eup %5772  ;;  %v1688_v16 = vmul.f32 1.442695, %v1640_v55  ;;  %v1593_v51 = vpop.xlane.xlu1 %1592  ;;  %v1759_v11 = vsel %vm1527_vm3, %v6613_v53, 0.0 }
 0x31f   : > { %5782 = vpow2.f32 %v1690_v13  ;;  %v1645_v28 = vsub.f32 %v6493_v3, %v1593_v51  ;;  %v1590_v14 = vpop.xlane.xlu0 %1589  ;;  %1760 = vadd.xlane.f32.xlu1 %v1759_v11  ;;  %v1756_v8 = vsel %vm1527_vm3, %v6615_v27, 0.0 }
 0x320   : > { %5784 = vpow2.f32 %v1688_v16  ;;  %v1644_v20 = vsub.f32 %v6495_v0, %v1590_v14  ;;  %1757 = vadd.xlane.f32.xlu0 %v1756_v8 }
 0x321   : > { %v6623_v9 = vpop.eup %5774  ;;  %v1698_v29 = vmul.f32 1.442695, %v1645_v28 }
 0x322   : > { %v6625_v15 = vpop.eup %5776  ;;  %v1696_v12 = vmul.f32 1.442695, %v1644_v20  ;;  %v1587_v24 = vpop.xlane.xlu1 %1586  ;;  %v1753_v19 = vsel %vm1527_vm3, %v6623_v9, 0.0 }
 0x323   : > { %5786 = vpow2.f32 %v1698_v29  ;;  %v1643_v3 = vsub.f32 %v6485_v5, %v1587_v24  ;;  %v1584_v57 = vpop.xlane.xlu0 %1583  ;;  %1754 = vadd.xlane.f32.xlu1 %v1753_v19  ;;  %v1750_v22 = vsel %vm1527_vm3, %v6625_v15, 0.0 }
 0x324   : > { %5788 = vpow2.f32 %v1696_v12  ;;  %v1642_v0 = vsub.f32 %v6489_v26, %v1584_v57  ;;  %1751 = vadd.xlane.f32.xlu0 %v1750_v22 }
 0x325   : > { %v6633_v59 = vpop.eup %5778  ;;  %v1694_v55 = vmul.f32 1.442695, %v1643_v3 }
 0x326   : > { %v6635_v13 = vpop.eup %5780  ;;  %v1692_v16 = vmul.f32 1.442695, %v1642_v0  ;;  %v1599_v51 = vpop.xlane.xlu1 %1598  ;;  %v1765_v11 = vsel %vm1527_vm3, %v6633_v59, 0.0 }
 0x327   : > { %5790 = vpow2.f32 %v1694_v55  ;;  %v1647_v5 = vsub.f32 %v6508_v30, %v1599_v51  ;;  %v1596_v28 = vpop.xlane.xlu0 %1595  ;;  %1766 = vadd.xlane.f32.xlu1 %v1765_v11  ;;  %v1762_v14 = vsel %vm1527_vm3, %v6635_v13, 0.0  ;;  %v7586_v51 = vmov 0.0  }
 0x328   : > { %5792 = vpow2.f32 %v1692_v16  ;;  %v1646_v26 = vsub.f32 %v6513_v60, %v1596_v28  ;;  %1763 = vadd.xlane.f32.xlu0 %v1762_v14  ;;  %v6652_v60 = vpop.f32.mrb[16].mxu0  ;;  %5241 = vmatprep.mubr.msk.f32.mxu1 %vm6071_vm4, %v7586_v51 }
 0x329   : > { %v6643_v8 = vpop.eup %5782  ;;  %v1702_v20 = vmul.f32 1.442695, %v1647_v5  ;;  %v6655_v0 = vpop.f32.mrb[17].mxu0  ;;  %5263 = vmatprep.mubr.msk.f32.mxu0 %vm6071_vm4, %v7586_v51 }
 0x32a   : > { %v6645_v29 = vpop.eup %5784  ;;  %v1700_v12 = vmul.f32 1.442695, %v1646_v26  ;;  %v1605_v24 = vpop.xlane.xlu1 %1604  ;;  %v1771_v19 = vsel %vm1527_vm3, %v6643_v8, 0.0 }
 0x32b   : > { %5794 = vpow2.f32 %v1702_v20  ;;  %v1649_v30 = vsub.f32 %v6517_v21, %v1605_v24  ;;  %v1602_v3 = vpop.xlane.xlu0 %1601  ;;  %1772 = vadd.xlane.f32.xlu1 %v1771_v19  ;;  %v1768_v57 = vsel %vm1527_vm3, %v6645_v29, 0.0 }
 0x32c   : > { %5796 = vpow2.f32 %v1700_v12  ;;  %v1648_v22 = vsub.f32 %v6521_v56, %v1602_v3  ;;  %1769 = vadd.xlane.f32.xlu0 %v1768_v57 }
 0x32d   : > { %v6657_v55 = vpop.eup %5786  ;;  %v1706_v16 = vmul.f32 1.442695, %v1649_v30 }
 0x32e   : > { %v6663_v21 = vpop.eup %5788  ;;  %v1704_v11 = vmul.f32 1.442695, %v1648_v22  ;;  %v1617_v5 = vpop.xlane.xlu1 %1616  ;;  %v1783_v56 = vsel %vm1527_vm3, %v6657_v55, 0.0 }
 0x32f   : > { %5798 = vpow2.f32 %v1706_v16  ;;  %v1653_v28 = vsub.f32 %v6533_v6, %v1617_v5  ;;  %v1614_v14 = vpop.xlane.xlu0 %1613  ;;  %1784 = vadd.xlane.f32.xlu1 %v1783_v56  ;;  %v1780_v26 = vsel %vm1527_vm3, %v6663_v21, 0.0 }
 0x330   : > { %5800 = vpow2.f32 %v1704_v11  ;;  %v1652_v20 = vsub.f32 %v6535_v4, %v1614_v14  ;;  %1781 = vadd.xlane.f32.xlu0 %v1780_v26 }
 0x331   : > { %v6671_v12 = vpop.eup %5790  ;;  %v1714_v24 = vmul.f32 1.442695, %v1653_v28 }
 0x332   : > { %v6673_v19 = vpop.eup %5792  ;;  %v1712_v30 = vmul.f32 1.442695, %v1652_v20  ;;  %v1611_v3 = vpop.xlane.xlu1 %1610  ;;  %v1777_v57 = vsel %vm1527_vm3, %v6671_v12, 0.0 }
 0x333   : > { %5802 = vpow2.f32 %v1714_v24  ;;  %v1651_v6 = vsub.f32 %v6525_v54, %v1611_v3  ;;  %v1608_v22 = vpop.xlane.xlu0 %1607  ;;  %1778 = vadd.xlane.f32.xlu1 %v1777_v57  ;;  %v1774_v16 = vsel %vm1527_vm3, %v6673_v19, 0.0 }
 0x334   : > { %5804 = vpow2.f32 %v1712_v30  ;;  %v1650_v4 = vsub.f32 %v6529_v7, %v1608_v22  ;;  %1775 = vadd.xlane.f32.xlu0 %v1774_v16 }
 0x335   : > { %v6681_v11 = vpop.eup %5794  ;;  %v1710_v5 = vmul.f32 1.442695, %v1651_v6 }
 0x336   : > { %v6683_v56 = vpop.eup %5796  ;;  %v1708_v28 = vmul.f32 1.442695, %v1650_v4  ;;  %v1623_v14 = vpop.xlane.xlu1 %1622  ;;  %v1789_v26 = vsel %vm1527_vm3, %v6681_v11, 0.0 }
 0x337   : > { %5806 = vpow2.f32 %v1710_v5  ;;  %v1655_v54 = vsub.f32 %v6541_v2, %v1623_v14  ;;  %1790 = vadd.xlane.f32.xlu1 %v1789_v26  ;;  %v1620_v20 = vpop.xlane.xlu0 %1619  ;;  %v1786_v24 = vsel %vm1527_vm3, %v6683_v56, 0.0 }
 0x338   : > { %5808 = vpow2.f32 %v1708_v28  ;;  %v1654_v7 = vsub.f32 %v6545_v63, %v1620_v20  ;;  %1787 = vadd.xlane.f32.xlu0 %v1786_v24 }
 0x339   : > { %v6691_v30 = vpop.eup %5798  ;;  %v1718_v3 = vmul.f32 1.442695, %v1655_v54 }
 0x33a   : > { %v6693_v57 = vpop.eup %5800  ;;  %v1716_v6 = vmul.f32 1.442695, %v1654_v7  ;;  %v1795_v22 = vsel %vm1527_vm3, %v6691_v30, 0.0 }
 0x33b   : > { %5810 = vpow2.f32 %v1718_v3  ;;  %1796 = vadd.xlane.f32.xlu1 %v1795_v22  ;;  %v1792_v2 = vsel %vm1527_vm3, %v6693_v57, 0.0 }
 0x33c   : > { %5812 = vpow2.f32 %v1716_v6  ;;  %1793 = vadd.xlane.f32.xlu0 %v1792_v2  ;;  %v6723_v6 = vpop.f32.mrb[18].mxu0 }
 0x33d   : > { %v6699_v16 = vpop.eup %5802  ;;  %v6725_v22 = vpop.f32.mrb[19].mxu0 }
 0x33e   : > { %v6701_v63 = vpop.eup %5804  ;;  %v1807_v4 = vsel %vm1527_vm3, %v6699_v16, 0.0 }
 0x33f   : > { %1808 = vadd.xlane.f32.xlu1 %v1807_v4  ;;  %v1804_v5 = vsel %vm1527_vm3, %v6701_v63, 0.0 }
 0x340   : > { %1805 = vadd.xlane.f32.xlu0 %v1804_v5 }
 0x341   : > { %v6707_v28 = vpop.eup %5806 }
 0x342   : > { %v6709_v14 = vpop.eup %5808  ;;  %v1801_v26 = vsel %vm1527_vm3, %v6707_v28, 0.0 }
 0x343   : > { %1802 = vadd.xlane.f32.xlu1 %v1801_v26  ;;  %v1798_v54 = vsel %vm1527_vm3, %v6709_v14, 0.0  ;;  %v6727_v2 = vpop.f32.mrb[20].mxu0 }
 0x344   : > { %1799 = vadd.xlane.f32.xlu0 %v1798_v54  ;;  %v6731_v4 = vpop.f32.mrb[21].mxu0 }
 0x345   : > { %v6715_v20 = vpop.eup %5810 }
 0x346   : > { %v6717_v24 = vpop.eup %5812  ;;  %v1813_v7 = vsel %vm1527_vm3, %v6715_v20, 0.0 }
 0x347   : > { %1814 = vadd.xlane.f32.xlu1 %v1813_v7  ;;  %v1810_v3 = vsel %vm1527_vm3, %v6717_v24, 0.0 }
 0x348   : > { %1811 = vadd.xlane.f32.xlu0 %v1810_v3 }
 0x358   : > { %2818 = vrot.lane.b32.xlu1 %v6233_v31, %s6073_s29 }
 0x35c   : > { %2907 = vrot.lane.b32.xlu1 %v6242_v34, %s6073_s29 }
 0x35e   : > { %2729 = vrot.lane.b32.xlu0 %v6235_v32, %s6073_s29 }
 0x360   : > { %3085 = vrot.lane.b32.xlu1 %v6246_v36, %s6073_s29 }
 0x361   : > { %v6743_v5 = vpop.f32.mrb[22].mxu0 }
 0x362   : > { %2996 = vrot.lane.b32.xlu0 %v6240_v33, %s6073_s29  ;;  %v6745_v31 = vpop.f32.mrb[23].mxu0 }
 0x366   : > { %3174 = vrot.lane.b32.xlu0 %v6244_v35, %s6073_s29 }
 0x36a   : > { %3263 = vrot.lane.b32.xlu0 %v6250_v38, %s6073_s29 }
 0x36e   : > { %3352 = vrot.lane.b32.xlu0 %v6248_v37, %s6073_s29 }
 0x388   : > { %v1725_v32 = vpop.xlane.xlu1 %1724 }
 0x389   : > { %5814 = vrcp.f32 %v1725_v32  ;;  %v1722_v34 = vpop.xlane.xlu0 %1721 }
 0x38a   : > { %5816 = vrcp.f32 %v1722_v34 }
 0x391   : > { %v1728_v36 = vpop.xlane.xlu0 %1727 }
 0x392   : > { %5818 = vrcp.f32 %v1728_v36 }
 0x393   : > { %v5815_v26 = vpop.eup %5814 }
 0x394   : > { %v5817_v33 = vpop.eup %5816  ;;  %v1849_v54 = vmul.f32 %v5815_v26, %v6557_v61 }
 0x395   : > { %v1848_v35 = vmul.f32 %v5817_v33, %v6559_v62  ;;  %v1731_v7 = vpop.xlane.xlu1 %1730 }
 0x396   : > { %5820 = vrcp.f32 %v1731_v7 }
 0x397   : > { %v5530_v37 = vpack.c.bf16 %v1849_v54, %v1848_v35 }
 0x399   : > { %v1737_v3 = vpop.xlane.xlu1 %1736  ;;  %5532 = vmatpush3.bf16.xpose.msk.msra.mxu1 %vm6755_vm5, %v5530_v37 }
 0x39a   : > { %5822 = vrcp.f32 %v1737_v3  ;;  %v1734_v32 = vpop.xlane.xlu0 %1733  ;;  %5533 = vmatprep.subr.bf16.mxu1 %v6070_v58 }
 0x39b   : > { %5824 = vrcp.f32 %v1734_v32 }
 0x39c   : > { %v5819_v61 = vpop.eup %5818 }
 0x39d   : > { %v1850_v36 = vmul.f32 %v5819_v61, %v6567_v45 }
 0x3a0   : > { %v5821_v62 = vpop.eup %5820  ;;  %v1743_v34 = vpop.xlane.xlu1 %1742 }
 0x3a1   : > { %v1851_v26 = vmul.f32 %v5821_v62, %v6573_v10  ;;  %5826 = vrcp.f32 %v1743_v34  ;;  %v1740_v33 = vpop.xlane.xlu0 %1739 }
 0x3a2   : > { %5828 = vrcp.f32 %v1740_v33 }
 0x3a3   : > { %v5534_v54 = vpack.c.bf16 %v1851_v26, %v1850_v36  ;;  %v7616_v36 = vmov 0.0  }
 0x3a4   : > { %v5823_v35 = vpop.eup %5822  ;;  %v1749_v7 = vpop.xlane.xlu1 %1748 }
 0x3a5   : > { %v5825_v51 = vpop.eup %5824  ;;  %5830 = vrcp.f32 %v1749_v7  ;;  %5536 = vmatpush3.bf16.xpose.msk.msra.mxu1 %vm6755_vm5, %v5534_v54  ;;  %v1746_v37 = vpop.xlane.xlu0 %1745  ;;  %v1853_v3 = vmul.f32 %v5823_v35, %v6579_v49 }
 0x3a6   : > { %5832 = vrcp.f32 %v1746_v37  ;;  %5537 = vmatprep.subr.bf16.mxu1 %v6070_v58  ;;  %v1852_v45 = vmul.f32 %v5825_v51, %v6581_v47 }
 0x3a8   : > { %v5538_v32 = vpack.c.bf16 %v1853_v3, %v1852_v45 }
 0x3ab   : > { %v5827_v10 = vpop.eup %5826 }
 0x3ac   : > { %v5829_v61 = vpop.eup %5828  ;;  %v1761_v62 = vpop.xlane.xlu1 %1760  ;;  %5242 = vmatmul.mubr.msk.f32.vlgmr.msra.gmra.mrb[32].mxu1 %vm1527_vm3, %v6655_v0  ;;  %v1855_v47 = vmul.f32 %v5827_v10, %v6589_v17 }
 0x3ad   : > { %5834 = vrcp.f32 %v1761_v62  ;;  %v1758_v34 = vpop.xlane.xlu0 %1757  ;;  %5540 = vmatpush3.bf16.xpose.msk.msra.mxu1 %vm6755_vm5, %v5538_v32  ;;  %5252 = vmatprep.mubr.msk.f32.mxu1 %vm6071_vm4, %v7616_v36  ;;  %v1854_v51 = vmul.f32 %v5829_v61, %v6591_v18 }
 0x3ae   : > { %5836 = vrcp.f32 %v1758_v34  ;;  %5541 = vmatprep.subr.bf16.mxu1 %v6070_v58 }
 0x3af   : > { %v5831_v49 = vpop.eup %5830  ;;  %v5542_v3 = vpack.c.bf16 %v1855_v47, %v1854_v51 }
 0x3b0   : > { %v5833_v26 = vpop.eup %5832  ;;  %v1857_v33 = vmul.f32 %v5831_v49, %v6599_v23  ;;  %v1755_v54 = vpop.xlane.xlu1 %1754 }
 0x3b1   : > { %v1856_v35 = vmul.f32 %v5833_v26, %v6601_v25  ;;  %5838 = vrcp.f32 %v1755_v54  ;;  %v1752_v7 = vpop.xlane.xlu0 %1751 }
 0x3b2   : > { %5840 = vrcp.f32 %v1752_v7 }
 0x3b3   : > { %v5546_v37 = vpack.c.bf16 %v1857_v33, %v1856_v35 }
 0x3b4   : > { %v1767_v45 = vpop.xlane.xlu1 %1766 }
 0x3b5   : > { %5842 = vrcp.f32 %v1767_v45  ;;  %5548 = vmatpush3.bf16.xpose.msk.msra.mxu0 %vm6755_vm5, %v5546_v37  ;;  %v1764_v32 = vpop.xlane.xlu0 %1763  ;;  %5544 = vmatpush3.bf16.xpose.msk.msra.mxu1 %vm6755_vm5, %v5542_v3 }
 0x3b6   : > { %5844 = vrcp.f32 %v1764_v32  ;;  %5553 = vmatprep.subr.bf16.mxu1 %v6070_v58  ;;  %5549 = vmatprep.subr.bf16.mxu0 %v6070_v58 }
 0x3b7   : > { %v5835_v17 = vpop.eup %5834 }
 0x3b8   : > { %v5837_v18 = vpop.eup %5836  ;;  %v1861_v23 = vmul.f32 %v5835_v17, %v6613_v53  ;;  %v1773_v25 = vpop.xlane.xlu1 %1772 }
 0x3b9   : > { %v1860_v10 = vmul.f32 %v5837_v18, %v6615_v27  ;;  %5846 = vrcp.f32 %v1773_v25  ;;  %v1770_v61 = vpop.xlane.xlu0 %1769 }
 0x3ba   : > { %5848 = vrcp.f32 %v1770_v61 }
 0x3bb   : > { %v5839_v62 = vpop.eup %5838  ;;  %v5554_v34 = vpack.c.bf16 %v1861_v23, %v1860_v10 }
 0x3bc   : > { %v5841_v49 = vpop.eup %5840  ;;  %v1859_v47 = vmul.f32 %v5839_v62, %v6623_v9  ;;  %v1785_v51 = vpop.xlane.xlu1 %1784  ;;  %5253 = vmatmul.mubr.msk.f32.vlgmr.msra.gmra.mrb[34].mxu1 %vm1527_vm3, %v6652_v60 }
 0x3bd   : > { %v1858_v26 = vmul.f32 %v5841_v49, %v6625_v15  ;;  %5850 = vrcp.f32 %v1785_v51  ;;  %v1782_v33 = vpop.xlane.xlu0 %1781  ;;  %5556 = vmatpush3.bf16.xpose.msk.msra.mxu1 %vm6755_vm5, %v5554_v34  ;;  %5274 = vmatprep.mubr.msk.f32.mxu1 %vm6071_vm4, %v7616_v36 }
 0x3be   : > { %5852 = vrcp.f32 %v1782_v33  ;;  %5557 = vmatprep.subr.bf16.mxu1 %v6070_v58 }
 0x3bf   : > { %v5843_v53 = vpop.eup %5842  ;;  %v5550_v27 = vpack.c.bf16 %v1859_v47, %v1858_v26 }
 0x3c0   : > { %v5845_v9 = vpop.eup %5844  ;;  %v1863_v54 = vmul.f32 %v5843_v53, %v6633_v59  ;;  %v1779_v35 = vpop.xlane.xlu1 %1778 }
 0x3c1   : > { %v1862_v7 = vmul.f32 %v5845_v9, %v6635_v13  ;;  %5854 = vrcp.f32 %v1779_v35  ;;  %5552 = vmatpush3.bf16.xpose.msk.msra.mxu0 %vm6755_vm5, %v5550_v27  ;;  %v1776_v15 = vpop.xlane.xlu0 %1775 }
 0x3c2   : > { %5856 = vrcp.f32 %v1776_v15  ;;  %5561 = vmatprep.subr.bf16.mxu0 %v6070_v58 }
 0x3c3   : > { %v5847_v37 = vpop.eup %5846  ;;  %v5558_v3 = vpack.c.bf16 %v1863_v54, %v1862_v7 }
 0x3c4   : > { %v5849_v45 = vpop.eup %5848  ;;  %v1865_v32 = vmul.f32 %v5847_v37, %v6643_v8  ;;  %v1791_v17 = vpop.xlane.xlu1 %1790 }
 0x3c5   : > { %v1864_v18 = vmul.f32 %v5849_v45, %v6645_v29  ;;  %5858 = vrcp.f32 %v1791_v17  ;;  %v1788_v59 = vpop.xlane.xlu0 %1787  ;;  %5560 = vmatpush3.bf16.xpose.msk.msra.mxu1 %vm6755_vm5, %v5558_v3 }
 0x3c6   : > { %5860 = vrcp.f32 %v1788_v59  ;;  %5569 = vmatprep.subr.bf16.mxu1 %v6070_v58  ;;  %v2560_v59 = vld [vmem:[%s7561_s2] sm:$0xff] }
 0x3c7   : > { %v5851_v13 = vpop.eup %5850  ;;  %v5562_v23 = vpack.c.bf16 %v1865_v32, %v1864_v18 }
 0x3c8   : > { %v5853_v25 = vpop.eup %5852  ;;  %v1869_v10 = vmul.f32 %v5851_v13, %v6657_v55  ;;  %v1797_v61 = vpop.xlane.xlu1 %1796  ;;  %5264 = vmatmul.mubr.msk.f32.vlgmr.msra.gmra.mrb[24].mxu0 %vm1527_vm3, %v6725_v22 }
 0x3c9   : > { %v1868_v8 = vmul.f32 %v5853_v25, %v6663_v21  ;;  %5862 = vrcp.f32 %v1797_v61  ;;  %v1794_v29 = vpop.xlane.xlu0 %1793  ;;  %5564 = vmatpush3.bf16.xpose.msk.msra.mxu0 %vm6755_vm5, %v5562_v23  ;;  %5285 = vmatprep.mubr.msk.f32.mxu0 %vm6071_vm4, %v7616_v36 }
 0x3ca   : > { %5864 = vrcp.f32 %v1794_v29  ;;  %5565 = vmatprep.subr.bf16.mxu0 %v6070_v58 }
 0x3cb   : > { %v5855_v62 = vpop.eup %5854  ;;  %v5570_v34 = vpack.c.bf16 %v1869_v10, %v1868_v8 }
 0x3cc   : > { %v5857_v55 = vpop.eup %5856  ;;  %v1867_v49 = vmul.f32 %v5855_v62, %v6671_v12  ;;  %v1809_v47 = vpop.xlane.xlu1 %1808  ;;  %5275 = vmatmul.mubr.msk.f32.vlgmr.msra.gmra.mrb[36].mxu1 %vm1527_vm3, %v6723_v6  ;;  %v2562_v62 = vld [vmem:[%s7561_s2 + $0x10] sm:$0xff] }
 0x3cd   : > { %v1866_v21 = vmul.f32 %v5857_v55, %v6673_v19  ;;  %5866 = vrcp.f32 %v1809_v47  ;;  %v1806_v51 = vpop.xlane.xlu0 %1805  ;;  %5572 = vmatpush3.bf16.xpose.msk.msra.mxu1 %vm6755_vm5, %v5570_v34  ;;  %5296 = vmatprep.mubr.msk.f32.mxu1 %vm6071_vm4, %v7616_v36  ;;  %v2563_v34 = vld [vmem:[%s7561_s2 + $0x18] sm:$0xff]  ;;  %v2565_v47 = vld [vmem:[%s7561_s2 + $0x28] sm:$0xff] }
 0x3ce   : > { %5868 = vrcp.f32 %v1806_v51  ;;  %5573 = vmatprep.subr.bf16.mxu1 %v6070_v58 }
 0x3cf   : > { %v5859_v26 = vpop.eup %5858  ;;  %v5566_v33 = vpack.c.bf16 %v1867_v49, %v1866_v21  ;;  %v2564_v49 = vld [vmem:[%s7561_s2 + $0x20] sm:$0xff] }
 0x3d0   : > { %v5861_v12 = vpop.eup %5860  ;;  %v1871_v53 = vmul.f32 %v5859_v26, %v6681_v11  ;;  %v1803_v27 = vpop.xlane.xlu1 %1802  ;;  %v6896_v21 = vpack.c.bf16 %v2565_v47, %v2564_v49 }
 0x3d1   : > { %v1870_v9 = vmul.f32 %v5861_v12, %v6683_v56  ;;  %5870 = vrcp.f32 %v1803_v27  ;;  %v1800_v19 = vpop.xlane.xlu0 %1799  ;;  %5568 = vmatpush3.bf16.xpose.msk.msra.mxu0 %vm6755_vm5, %v5566_v33  ;;  %v7621_v12 = vld [vmem:[#allocation9_spill] sm:$0xff] }
 0x3d2   : > { %5872 = vrcp.f32 %v1800_v19  ;;  %5577 = vmatprep.subr.bf16.mxu0 %v6070_v58  ;;  %v7623_v27 = vld [vmem:[#allocation13_spill] sm:$0xff] }
 0x3d3   : > { %v5863_v54 = vpop.eup %5862  ;;  %v5574_v35 = vpack.c.bf16 %v1871_v53, %v1870_v9  ;;  %v7622_v53 = vld [vmem:[#allocation11_spill] sm:$0xff]  ;;  %v7625_v19 = vld [vmem:[#allocation17_spill] sm:$0xff] }
 0x3d4   : > { %v5865_v7 = vpop.eup %5864  ;;  %v1873_v15 = vmul.f32 %v5863_v54, %v6691_v30  ;;  %v1815_v37 = vpop.xlane.xlu1 %1814  ;;  %v7624_v9 = vld [vmem:[#allocation15_spill] sm:$0xff] }
 0x3d5   : > { %v1872_v3 = vmul.f32 %v5865_v7, %v6693_v57  ;;  %5874 = vrcp.f32 %v1815_v37  ;;  %v1812_v11 = vpop.xlane.xlu0 %1811  ;;  %5576 = vmatpush3.bf16.xpose.msk.msra.mxu1 %vm6755_vm5, %v5574_v35  ;;  %v7626_v54 = vld [vmem:[#allocation19_spill] sm:$0xff]  ;;  %v7627_v35 = vld [vmem:[#allocation21_spill] sm:$0xff]  ;;  %v7630_v37 = vld [vmem:[#allocation26_spill] sm:$0xff] }
 0x3d6   : > { %5876 = vrcp.f32 %v1812_v11  ;;  %5585 = vmatprep.subr.bf16.mxu1 %v6070_v58  ;;  %v7628_v7 = vld [vmem:[#allocation23_spill] sm:$0xff] }
 0x3d7   : > { %v5867_v56 = vpop.eup %5866  ;;  %v5578_v45 = vpack.c.bf16 %v1873_v15, %v1872_v3  ;;  %v7629_v15 = vld [vmem:[#allocation25_spill] sm:$0xff] }
 0x3d8   : > { %v5869_v32 = vpop.eup %5868  ;;  %v1877_v17 = vmul.f32 %v5867_v56, %v6699_v16  ;;  %5286 = vmatmul.mubr.msk.f32.vlgmr.msra.gmra.mrb[26].mxu0 %vm1527_vm3, %v6731_v4  ;;  %v2561_v16 = vld [vmem:[%s7561_s2 + $0x8] sm:$0xff] }
 0x3d9   : > { %v1876_v30 = vmul.f32 %v5869_v32, %v6701_v63  ;;  %5580 = vmatpush3.bf16.xpose.msk.msra.mxu0 %vm6755_vm5, %v5578_v45  ;;  %5307 = vmatprep.mubr.msk.f32.mxu0 %vm6071_vm4, %v7616_v36  ;;  %v6859_v25 = vpack.c.bf16 %v2561_v16, %v2560_v59  ;;  %v2730_v55 = vpop.permute.xlu0 %2729 }
 0x3da   : > { %5581 = vmatprep.subr.bf16.mxu0 %v6070_v58 }
 0x3db   : > { %v5871_v57 = vpop.eup %5870  ;;  %v5586_v18 = vpack.c.bf16 %v1877_v17, %v1876_v30 }
 0x3dc   : > { %v5873_v13 = vpop.eup %5872  ;;  %v1875_v63 = vmul.f32 %v5871_v57, %v6707_v28  ;;  %5297 = vmatmul.mubr.msk.f32.vlgmr.msra.gmra.mrb[38].mxu1 %vm1527_vm3, %v6727_v2 }
 0x3dd   : > { %v1874_v23 = vmul.f32 %v5873_v13, %v6709_v14  ;;  %5588 = vmatpush3.bf16.xpose.msk.msra.mxu1 %vm6755_vm5, %v5586_v18  ;;  %5318 = vmatprep.mubr.msk.f32.mxu1 %vm6071_vm4, %v7616_v36 }
 0x3de   : > { %5589 = vmatprep.subr.bf16.mxu1 %v6070_v58 }
 0x3df   : > { %v5875_v10 = vpop.eup %5874  ;;  %v5582_v61 = vpack.c.bf16 %v1875_v63, %v1874_v23 }
 0x3e0   : > { %v5877_v8 = vpop.eup %5876  ;;  %v1879_v28 = vmul.f32 %v5875_v10, %v6715_v20  ;;  %v6876_v20 = vpack.c.bf16 %v2563_v34, %v2562_v62 }
 0x3e1   : > { %v1878_v29 = vmul.f32 %v5877_v8, %v6717_v24  ;;  %5584 = vmatpush3.bf16.xpose.msk.msra.mxu0 %vm6755_vm5, %v5582_v61  ;;  %v2819_v24 = vpop.permute.xlu1 %2818 }
 0x3e2   : > { %5595 = vmatprep.subr.msk.bf16.mxu0 %vm6161_vm1, %v6859_v25 }
 0x3e3   : > { %v5590_v14 = vpack.c.bf16 %v1879_v28, %v1878_v29 }
 0x3e5   : > { %5592 = vmatpush3.bf16.xpose.msk.msra.mxu1 %vm6755_vm5, %v5590_v14  ;;  %v2908_v51 = vpop.permute.xlu1 %2907 }
 0x3e6   : > { %5343 = vmatprep.subr.mxu1 %v2730_v55 }
 0x3e8   : > { %5308 = vmatmul.mubr.msk.f32.vlgmr.msra.gmra.mrb[28].mxu0 %vm1527_vm3, %v6745_v31 }
 0x3e9   : > { %5598 = vmatpush3.bf16.xpose.msk.msra.mxu0 %vm6161_vm1, %v6859_v25 }
 0x3ea   : > { %5601 = vmatprep.subr.msk.bf16.mxu0 %vm6161_vm1, %v6876_v20 }
 0x3ec   : > { %5319 = vmatmul.mubr.msk.f32.vlgmr.msra.gmra.mrb[40].mxu1 %vm1527_vm3, %v6743_v5 }
 0x3ed   : > { %5344 = vmatpush3.msra.mxu1 %v2730_v55  ;;  %5345 = vmatprep.mubr.msk.f32.mxu1 %vm526_vm2, %v6252_v39  ;;  %v2566_v39 = vld [vmem:[%s7561_s2 + $0x30] sm:$0xff] }
 0x3ee   : > { %5351 = vmatprep.subr.mxu1 %v2819_v24 }
 0x3f0   : > { %5346 = vmatmul.mubr.msk.f32.vlgmr.msra.gmra.mrb[42].mxu1 %vm526_vm2, %v6256_v40  ;;  %v2567_v40 = vld [vmem:[%s7561_s2 + $0x38] sm:$0xff] }
 0x3f1   : > { %5352 = vmatpush3.msra.mxu1 %v2819_v24  ;;  %5604 = vmatpush3.bf16.xpose.msk.msra.mxu0 %vm6161_vm1, %v6876_v20  ;;  %v6918_v26 = vpack.c.bf16 %v2567_v40, %v2566_v39 }
 0x3f2   : > { %5348 = vmatprep.mubr.msk.f32.mxu1 %vm526_vm2, %v6264_v42  ;;  %5359 = vmatprep.subr.mxu1 %v2908_v51  ;;  %v2997_v42 = vpop.permute.xlu0 %2996 }
 0x3f3   : > { %5607 = vmatprep.subr.msk.bf16.mxu0 %vm6161_vm1, %v6896_v21 }
 0x3f4   : > { %5349 = vmatmul.mubr.msk.f32.gmra.mrb[44].mxu1 %vm526_vm2, %v6270_v44 }
 0x3f5   : > { %5353 = vmatprep.mubr.msk.f32.mxu1 %vm526_vm2, %v6276_v46  ;;  %v6939_v46 = vpop.permute.xlu1 %3085 }
 0x3f6   : > { %v3175_v44 = vpop.permute.xlu0 %3174 }
 0x3f8   : > { %5354 = vmatmul.mubr.msk.f32.vlgmr.msra.gmra.mrb[46].mxu1 %vm526_vm2, %v6282_v48  ;;  %v7617_v48 = vld [vmem:[#allocation5_spill] sm:$0xff] }
 0x3f9   : > { %5360 = vmatpush3.msra.mxu1 %v2908_v51  ;;  %5610 = vmatpush3.bf16.xpose.msk.msra.mxu0 %vm6161_vm1, %v6896_v21 }
 0x3fa   : > { %5356 = vmatprep.mubr.msk.f32.mxu1 %vm526_vm2, %v6290_v50  ;;  %5367 = vmatprep.subr.mxu1 %v2997_v42  ;;  %v6943_v50 = vpop.permute.xlu0 %3263 }
 0x3fb   : > { %5613 = vmatprep.subr.msk.bf16.mxu0 %vm6161_vm1, %v6918_v26 }
 0x3fc   : > { %5357 = vmatmul.mubr.msk.f32.gmra.mrb[48].mxu1 %vm526_vm2, %v6296_v52  ;;  %v7618_v52 = vld [vmem:[#allocation6_spill] sm:$0xff] }
 0x3fd   : > { %5361 = vmatprep.mubr.msk.f32.mxu1 %vm526_vm2, %v6258_v41  ;;  %v7619_v41 = vld [vmem:[#allocation7_spill] sm:$0xff] }
 0x3fe   : > { %v3353_v33 = vpop.permute.xlu0 %3352 }
 0x400   : > { %5362 = vmatmul.mubr.msk.f32.vlgmr.msra.gmra.mrb[50].mxu1 %vm526_vm2, %v6266_v43  ;;  %v7620_v43 = vld [vmem:[#allocation8_spill] sm:$0xff] }
 0x401   : > { %5368 = vmatpush3.msra.mxu1 %v2997_v42  ;;  %5616 = vmatpush3.bf16.xpose.msk.msra.mxu0 %vm6161_vm1, %v6918_v26 }
 0x402   : > { %5364 = vmatprep.mubr.msk.f32.mxu1 %vm526_vm2, %v7617_v48  ;;  %5383 = vmatprep.subr.mxu1 %v3175_v44 }
 0x403   : > { %5375 = vmatprep.subr.mxu0 %v6939_v46 }
 0x404   : > { %5365 = vmatmul.mubr.msk.f32.gmra.mrb[52].mxu1 %vm526_vm2, %v7618_v52 }
 0x405   : > { %5369 = vmatprep.mubr.msk.f32.mxu1 %vm526_vm2, %v7619_v41 }
 0x408   : > { %5370 = vmatmul.mubr.msk.f32.vlgmr.msra.gmra.mrb[54].mxu1 %vm526_vm2, %v7620_v43 }
 0x409   : > { %5384 = vmatpush3.msra.mxu1 %v3175_v44  ;;  %5372 = vmatprep.mubr.msk.f32.mxu1 %vm526_vm2, %v7621_v12 }
 0x40a   : > { %5399 = vmatprep.subr.mxu1 %v3353_v33 }
 0x40c   : > { %5373 = vmatmul.mubr.msk.f32.gmra.mrb[56].mxu1 %vm526_vm2, %v7622_v53 }
 0x40d   : > { %5385 = vmatprep.mubr.msk.f32.mxu1 %vm526_vm2, %v7623_v27 }
 0x410   : > { %5386 = vmatmul.mubr.msk.f32.vlgmr.msra.gmra.mrb[58].mxu1 %vm526_vm2, %v7624_v9 }
 0x411   : > { %5400 = vmatpush3.msra.mxu1 %v3353_v33  ;;  %5388 = vmatprep.mubr.msk.f32.mxu1 %vm526_vm2, %v7625_v19 }
 0x412   : > { %5625 = vmatprep.subr.bf16.mxu1 %v6070_v58 }
 0x414   : > { %5389 = vmatmul.mubr.msk.f32.gmra.mrb[60].mxu1 %vm526_vm2, %v7626_v54 }
 0x415   : > { %5401 = vmatprep.mubr.msk.f32.mxu1 %vm526_vm2, %v7627_v35 }
 0x418   : > { %5402 = vmatmul.mubr.msk.f32.vlgmr.msra.gmra.mrb[62].mxu1 %vm526_vm2, %v7628_v7 }
 0x419   : > { %5404 = vmatprep.mubr.msk.f32.mxu1 %vm526_vm2, %v7629_v15 }
 0x41c   : > { %5405 = vmatmul.mubr.msk.f32.gmra.mrb[64].mxu1 %vm526_vm2, %v7630_v37 }
 0x41d   : > { %5426 = vmatprep.mubr.msk.f32.mxu1 %vm6071_vm4, %v7616_v36 }
 0x47f   : > { %v1961_v3 = vpop.f32.mrb[32].mxu1 }
 0x480   : > { %2575 = vxpose.xlu1.b32.start [1/8] (short) (narrow) %v1961_v3, 32  ;;  %v5243_v11 = vpop.f32.mrb[33].mxu1 }
 0x48f   : > { %v2046_v56 = vpop.f32.mrb[34].mxu1 }
 0x490   : > { %v5254_v45 = vpop.f32.mrb[35].mxu1  ;;  %2576 = vxpose.xlu1.b32.cont [2/8] (short) (narrow) %v2046_v56, 32 }
 0x49b   : > { %v2131_v32 = vpop.f32.mrb[24].mxu0 }
 0x49c   : > { %2577 = vxpose.xlu1.b32.cont [3/8] (short) (narrow) %v2131_v32, 32  ;;  %v5265_v17 = vpop.f32.mrb[25].mxu0 }
 0x49f   : > { %v2216_v30 = vpop.f32.mrb[36].mxu1 }
 0x4a0   : > { %2578 = vxpose.xlu1.b32.cont [4/8] (short) (narrow) %v2216_v30, 32  ;;  %v5276_v57 = vpop.f32.mrb[37].mxu1 }
 0x4ab   : > { %v2301_v18 = vpop.f32.mrb[26].mxu0 }
 0x4ac   : > { %2579 = vxpose.xlu1.b32.cont [5/8] (short) (narrow) %v2301_v18, 32  ;;  %v5287_v59 = vpop.f32.mrb[27].mxu0 }
 0x4af   : > { %v2386_v16 = vpop.f32.mrb[38].mxu1 }
 0x4b0   : > { %2580 = vxpose.xlu1.b32.cont [6/8] (short) (narrow) %v2386_v16, 32  ;;  %v5298_v13 = vpop.f32.mrb[39].mxu1 }
 0x4bb   : > { %v2471_v63 = vpop.f32.mrb[28].mxu0 }
 0x4bc   : > { %2581 = vxpose.xlu1.b32.cont [7/8] (short) (narrow) %v2471_v63, 32  ;;  %v5309_v23 = vpop.f32.mrb[29].mxu0 }
 0x4bf   : > { %v2556_v10 = vpop.f32.mrb[40].mxu1 }
 0x4c0   : > { %2582 = vxpose.xlu1.b32.end [8/8] (short) (narrow) %v2556_v10, 32  ;;  %v5320_v61 = vpop.f32.mrb[41].mxu1 }
 0x4c3   : > { %v6975_v8 = vpop.f32.mrb[42].mxu1 }
 0x4c4   : > { %v6977_v28 = vpop.f32.mrb[43].mxu1  ;;  %v3443_v29 = vsel %vm1527_vm3, %v6975_v8, -inf }
 0x4c5   : > { %3444 = vmax.xlane.f32.xlu0 %v3443_v29  ;;  %v3440_v34 = vsel %vm1527_vm3, %v6977_v28, -inf }
 0x4c7   : > { %v6981_v14 = vpop.f32.mrb[44].mxu1 }
 0x4c8   : > { %v6983_v62 = vpop.f32.mrb[45].mxu1  ;;  %v3449_v49 = vsel %vm1527_vm3, %v6981_v14, -inf }
 0x4c9   : > { %3441 = vmax.xlane.f32.xlu0 %v3440_v34  ;;  %v3446_v39 = vsel %vm1527_vm3, %v6983_v62, -inf }
 0x4cb   : > { %v6987_v55 = vpop.f32.mrb[46].mxu1 }
 0x4cc   : > { %v6989_v24 = vpop.f32.mrb[47].mxu1  ;;  %v3455_v44 = vsel %vm1527_vm3, %v6987_v55, -inf }
 0x4cd   : > { %3450 = vmax.xlane.f32.xlu0 %v3449_v49  ;;  %v3452_v41 = vsel %vm1527_vm3, %v6989_v24, -inf }
 0x4cf   : > { %v6993_v47 = vpop.f32.mrb[48].mxu1 }
 0x4d0   : > { %v6995_v51 = vpop.f32.mrb[49].mxu1  ;;  %v3461_v12 = vsel %vm1527_vm3, %v6993_v47, -inf }
 0x4d1   : > { %3447 = vmax.xlane.f32.xlu0 %v3446_v39  ;;  %v3458_v9 = vsel %vm1527_vm3, %v6995_v51, -inf }
 0x4d3   : > { %v6999_v40 = vpop.f32.mrb[50].mxu1 }
 0x4d4   : > { %v7001_v42 = vpop.f32.mrb[51].mxu1  ;;  %v3467_v35 = vsel %vm1527_vm3, %v6999_v40, -inf }
 0x4d5   : > { %3456 = vmax.xlane.f32.xlu0 %v3455_v44  ;;  %v3464_v7 = vsel %vm1527_vm3, %v7001_v42, -inf }
 0x4d7   : > { %v7005_v48 = vpop.f32.mrb[52].mxu1 }
 0x4d8   : > { %v7007_v52 = vpop.f32.mrb[53].mxu1  ;;  %v3473_v3 = vsel %vm1527_vm3, %v7005_v48, -inf }
 0x4d9   : > { %3453 = vmax.xlane.f32.xlu0 %v3452_v41  ;;  %v3470_v32 = vsel %vm1527_vm3, %v7007_v52, -inf }
 0x4db   : > { %v7011_v43 = vpop.f32.mrb[54].mxu1 }
 0x4dc   : > { %v7013_v33 = vpop.f32.mrb[55].mxu1  ;;  %v3479_v18 = vsel %vm1527_vm3, %v7011_v43, -inf }
 0x4dd   : > { %3462 = vmax.xlane.f32.xlu0 %v3461_v12  ;;  %v3476_v16 = vsel %vm1527_vm3, %v7013_v33, -inf  ;;  %v7631_v12 = vld [vmem:[#allocation10_spill] sm:$0xff] }
 0x4df   : > { %v7017_v53 = vpop.f32.mrb[56].mxu1 }
 0x4e0   : > { %v7019_v27 = vpop.f32.mrb[57].mxu1  ;;  %v3485_v63 = vsel %vm1527_vm3, %v7017_v53, -inf }
 0x4e1   : > { %3459 = vmax.xlane.f32.xlu0 %v3458_v9  ;;  %v3482_v23 = vsel %vm1527_vm3, %v7019_v27, -inf  ;;  %v7632_v9 = vld [vmem:[#allocation12_spill] sm:$0xff] }
 0x4e3   : > { %v7023_v19 = vpop.f32.mrb[58].mxu1 }
 0x4e4   : > { %v7025_v54 = vpop.f32.mrb[59].mxu1  ;;  %v3503_v11 = vsel %vm1527_vm3, %v7023_v19, -inf }
 0x4e5   : > { %3468 = vmax.xlane.f32.xlu0 %v3467_v35  ;;  %v3500_v10 = vsel %vm1527_vm3, %v7025_v54, -inf  ;;  %v7633_v35 = vld [vmem:[#allocation14_spill] sm:$0xff] }
 0x4e7   : > { %v7031_v15 = vpop.f32.mrb[60].mxu1  ;;  %3465 = vmax.xlane.f32.xlu1 %v3464_v7  ;;  %v7635_v7 = vld [vmem:[#allocation18_spill] sm:$0xff] }
 0x4e8   : > { %v7033_v37 = vpop.f32.mrb[61].mxu1  ;;  %v3509_v17 = vsel %vm1527_vm3, %v7031_v15, -inf }
 0x4e9   : > { %3474 = vmax.xlane.f32.xlu0 %v3473_v3  ;;  %v3506_v61 = vsel %vm1527_vm3, %v7033_v37, -inf  ;;  %v7636_v3 = vld [vmem:[#allocation20_spill] sm:$0xff] }
 0x4eb   : > { %v7039_v56 = vpop.f32.mrb[62].mxu1  ;;  %3504 = vmax.xlane.f32.xlu1 %v3503_v11  ;;  %v7637_v11 = vld [vmem:[#allocation22_spill] sm:$0xff] }
 0x4ec   : > { %v7041_v45 = vpop.f32.mrb[63].mxu1  ;;  %v3527_v59 = vsel %vm1527_vm3, %v7039_v56, -inf }
 0x4ed   : > { %3471 = vmax.xlane.f32.xlu0 %v3470_v32  ;;  %v3524_v29 = vsel %vm1527_vm3, %v7041_v45, -inf  ;;  %v7638_v32 = vld [vmem:[#allocation24_spill] sm:$0xff] }
 0x4ef   : > { %v7047_v30 = vpop.f32.mrb[64].mxu1  ;;  %3510 = vmax.xlane.f32.xlu1 %v3509_v17 }
 0x4f0   : > { %v7049_v57 = vpop.f32.mrb[65].mxu1  ;;  %v3533_v13 = vsel %vm1527_vm3, %v7047_v30, -inf }
 0x4f1   : > { %3480 = vmax.xlane.f32.xlu0 %v3479_v18  ;;  %v3530_v34 = vsel %vm1527_vm3, %v7049_v57, -inf }
 0x4f3   : > { %3528 = vmax.xlane.f32.xlu1 %v3527_v59 }
 0x4f5   : > { %3477 = vmax.xlane.f32.xlu0 %v3476_v16 }
 0x4f7   : > { %3534 = vmax.xlane.f32.xlu1 %v3533_v13 }
 0x4f9   : > { %3486 = vmax.xlane.f32.xlu0 %v3485_v63 }
 0x4fd   : > { %3483 = vmax.xlane.f32.xlu0 %v3482_v23 }
 0x501   : > { %3501 = vmax.xlane.f32.xlu0 %v3500_v10 }
 0x505   : > { %3507 = vmax.xlane.f32.xlu0 %v3506_v61 }
 0x509   : > { %3525 = vmax.xlane.f32.xlu0 %v3524_v29 }
 0x50d   : > { %3531 = vmax.xlane.f32.xlu0 %v3530_v34 }
 0x524   : > { %v2591_v49 = vpop.trf.xlu1 }
 0x525   : > { %5337 = vmatprep.mubr.msk.f32.mxu0 %vm224_vm0, %v2591_v49 }
 0x528   : > { %v2592_v39 = vpop.trf.xlu1 }
 0x529   : > { %5338 = vmatmul.mubr.msk.f32.vlgmr.msra.gmra.mrb[30].mxu0 %vm224_vm0, %v2592_v39 }
 0x52a   : > { %5376 = vmatpush3.msra.mxu0 %v6939_v46  ;;  %v7634_v46 = vld [vmem:[#allocation16_spill] sm:$0xff] }
 0x52b   : > { %5391 = vmatprep.subr.mxu0 %v6943_v50 }
 0x52c   : > { %v2593_v44 = vpop.trf.xlu1 }
 0x52d   : > { %5340 = vmatprep.mubr.msk.f32.mxu0 %vm224_vm0, %v2593_v44 }
 0x530   : > { %v2594_v41 = vpop.trf.xlu1 }
 0x531   : > { %5341 = vmatmul.mubr.msk.f32.gmra.mrb[32].mxu0 %vm224_vm0, %v2594_v41 }
 0x532   : > { %5377 = vmatprep.mubr.msk.f32.mxu0 %vm526_vm2, %v7631_v12 }
 0x535   : > { %5378 = vmatmul.mubr.msk.f32.vlgmr.msra.gmra.mrb[34].mxu0 %vm526_vm2, %v7632_v9 }
 0x536   : > { %5392 = vmatpush3.msra.mxu0 %v6943_v50  ;;  %5380 = vmatprep.mubr.msk.f32.mxu0 %vm526_vm2, %v7633_v35 }
 0x537   : > { %5617 = vmatprep.subr.bf16.mxu0 %v6070_v58 }
 0x539   : > { %5381 = vmatmul.mubr.msk.f32.gmra.mrb[36].mxu0 %vm526_vm2, %v7634_v46 }
 0x53a   : > { %5393 = vmatprep.mubr.msk.f32.mxu0 %vm526_vm2, %v7635_v7 }
 0x53d   : > { %5394 = vmatmul.mubr.msk.f32.vlgmr.msra.gmra.mrb[38].mxu0 %vm526_vm2, %v7636_v3 }
 0x53e   : > { %5396 = vmatprep.mubr.msk.f32.mxu0 %vm526_vm2, %v7637_v11 }
 0x541   : > { %5397 = vmatmul.mubr.msk.f32.gmra.mrb[40].mxu0 %vm526_vm2, %v7638_v32 }
 0x542   : > { %5415 = vmatprep.mubr.msk.f32.mxu0 %vm6071_vm4, %v7616_v36 }
 0x552   : > { %v3445_v50 = vpop.xlane.xlu0 %3444 }
 0x553   : > { %v3537_v17 = vsub.f32 %v6975_v8, %v3445_v50 }
 0x555   : > { %v3570_v18 = vmul.f32 1.442695, %v3537_v17 }
 0x556   : > { %v3442_v59 = vpop.xlane.xlu0 %3441 }
 0x557   : > { %5878 = vpow2.f32 %v3570_v18  ;;  %v3536_v16 = vsub.f32 %v6977_v28, %v3442_v59 }
 0x559   : > { %v3568_v13 = vmul.f32 1.442695, %v3536_v16 }
 0x55a   : > { %v3451_v63 = vpop.xlane.xlu0 %3450 }
 0x55b   : > { %5880 = vpow2.f32 %v3568_v13  ;;  %v3539_v23 = vsub.f32 %v6981_v14, %v3451_v63 }
 0x55d   : > { %v3574_v10 = vmul.f32 1.442695, %v3539_v23 }
 0x55e   : > { %v3448_v61 = vpop.xlane.xlu0 %3447 }
 0x55f   : > { %5882 = vpow2.f32 %v3574_v10  ;;  %v3538_v29 = vsub.f32 %v6983_v62, %v3448_v61 }
 0x561   : > { %v7101_v34 = vpop.eup %5878  ;;  %v3572_v49 = vmul.f32 1.442695, %v3538_v29 }
 0x562   : > { %v3457_v39 = vpop.xlane.xlu0 %3456  ;;  %v3635_v8 = vsel %vm1527_vm3, %v7101_v34, 0.0 }
 0x563   : > { %5884 = vpow2.f32 %v3572_v49  ;;  %v3541_v28 = vsub.f32 %v6987_v55, %v3457_v39  ;;  %3636 = vadd.xlane.f32.xlu1 %v3635_v8 }
 0x565   : > { %v7106_v44 = vpop.eup %5880  ;;  %v3578_v41 = vmul.f32 1.442695, %v3541_v28 }
 0x566   : > { %v3454_v14 = vpop.xlane.xlu0 %3453  ;;  %v3632_v12 = vsel %vm1527_vm3, %v7106_v44, 0.0 }
 0x567   : > { %5886 = vpow2.f32 %v3578_v41  ;;  %v3540_v62 = vsub.f32 %v6989_v24, %v3454_v14  ;;  %3633 = vadd.xlane.f32.xlu0 %v3632_v12 }
 0x569   : > { %v7111_v9 = vpop.eup %5882  ;;  %v3576_v35 = vmul.f32 1.442695, %v3540_v62 }
 0x56a   : > { %v3463_v46 = vpop.xlane.xlu0 %3462  ;;  %v3641_v7 = vsel %vm1527_vm3, %v7111_v9, 0.0 }
 0x56b   : > { %5888 = vpow2.f32 %v3576_v35  ;;  %v3543_v55 = vsub.f32 %v6993_v47, %v3463_v46  ;;  %3642 = vadd.xlane.f32.xlu1 %v3641_v7 }
 0x56d   : > { %v7116_v3 = vpop.eup %5884  ;;  %v3582_v11 = vmul.f32 1.442695, %v3543_v55 }
 0x56e   : > { %v3460_v32 = vpop.xlane.xlu0 %3459  ;;  %v3638_v50 = vsel %vm1527_vm3, %v7116_v3, 0.0 }
 0x56f   : > { %5890 = vpow2.f32 %v3582_v11  ;;  %v3542_v24 = vsub.f32 %v6995_v51, %v3460_v32  ;;  %3639 = vadd.xlane.f32.xlu0 %v3638_v50 }
 0x571   : > { %v7121_v17 = vpop.eup %5886  ;;  %v3580_v18 = vmul.f32 1.442695, %v3542_v24 }
 0x572   : > { %v3469_v59 = vpop.xlane.xlu0 %3468  ;;  %v3647_v16 = vsel %vm1527_vm3, %v7121_v17, 0.0 }
 0x573   : > { %5892 = vpow2.f32 %v3580_v18  ;;  %v3545_v47 = vsub.f32 %v6999_v40, %v3469_v59  ;;  %3648 = vadd.xlane.f32.xlu1 %v3647_v16 }
 0x574   : > { %v3466_v13 = vpop.xlane.xlu1 %3465 }
 0x575   : > { %v7126_v63 = vpop.eup %5888  ;;  %v3586_v23 = vmul.f32 1.442695, %v3545_v47  ;;  %v3544_v10 = vsub.f32 %v7001_v42, %v3466_v13 }
 0x576   : > { %v3475_v61 = vpop.xlane.xlu0 %3474  ;;  %v3644_v51 = vsel %vm1527_vm3, %v7126_v63, 0.0 }
 0x577   : > { %5894 = vpow2.f32 %v3586_v23  ;;  %v3584_v29 = vmul.f32 1.442695, %v3544_v10  ;;  %v3547_v49 = vsub.f32 %v7005_v48, %v3475_v61  ;;  %3645 = vadd.xlane.f32.xlu0 %v3644_v51 }
 0x578   : > { %v3505_v39 = vpop.xlane.xlu1 %3504 }
 0x579   : > { %v7132_v8 = vpop.eup %5890  ;;  %5896 = vpow2.f32 %v3584_v29  ;;  %v3590_v40 = vmul.f32 1.442695, %v3547_v49  ;;  %v3557_v16 = vsub.f32 %v7023_v19, %v3505_v39 }
 0x57a   : > { %v3472_v28 = vpop.xlane.xlu0 %3471  ;;  %v3653_v41 = vsel %vm1527_vm3, %v7132_v8, 0.0 }
 0x57b   : > { %5898 = vpow2.f32 %v3590_v40  ;;  %v3546_v42 = vsub.f32 %v7007_v52, %v3472_v28  ;;  %3654 = vadd.xlane.f32.xlu1 %v3653_v41 }
 0x57c   : > { %v3511_v14 = vpop.xlane.xlu1 %3510 }
 0x57d   : > { %v7137_v12 = vpop.eup %5892  ;;  %v3588_v62 = vmul.f32 1.442695, %v3546_v42  ;;  %v3559_v51 = vsub.f32 %v7031_v15, %v3511_v14 }
 0x57e   : > { %v3481_v35 = vpop.xlane.xlu0 %3480  ;;  %v3650_v48 = vsel %vm1527_vm3, %v7137_v12, 0.0 }
 0x57f   : > { %5900 = vpow2.f32 %v3588_v62  ;;  %v3549_v46 = vsub.f32 %v7011_v43, %v3481_v35  ;;  %3651 = vadd.xlane.f32.xlu0 %v3650_v48  ;;  %v3614_v28 = vmul.f32 1.442695, %v3559_v51 }
 0x580   : > { %v7142_v7 = vpop.xlane.xlu1 %3528 }
 0x581   : > { %v7144_v55 = vpop.eup %5894  ;;  %v3594_v11 = vmul.f32 1.442695, %v3549_v46  ;;  %v3565_v52 = vsub.f32 %v7039_v56, %v7142_v7 }
 0x582   : > { %v3478_v32 = vpop.xlane.xlu0 %3477  ;;  %v3659_v50 = vsel %vm1527_vm3, %v7144_v55, 0.0 }
 0x583   : > { %v7150_v24 = vpop.eup %5896  ;;  %5902 = vpow2.f32 %v3594_v11  ;;  %v3548_v18 = vsub.f32 %v7013_v33, %v3478_v32  ;;  %3660 = vadd.xlane.f32.xlu1 %v3659_v50  ;;  %v3610_v33 = vmul.f32 1.442695, %v3557_v16 }
 0x584   : > { %v3656_v43 = vsel %vm1527_vm3, %v7150_v24, 0.0 }
 0x585   : > { %v7155_v59 = vpop.eup %5898  ;;  %v3592_v47 = vmul.f32 1.442695, %v3548_v18  ;;  %3657 = vadd.xlane.f32.xlu0 %v3656_v43 }
 0x586   : > { %v3487_v13 = vpop.xlane.xlu0 %3486  ;;  %v3665_v23 = vsel %vm1527_vm3, %v7155_v59, 0.0 }
 0x587   : > { %5904 = vpow2.f32 %v3592_v47  ;;  %v3551_v10 = vsub.f32 %v7017_v53, %v3487_v13  ;;  %3666 = vadd.xlane.f32.xlu1 %v3665_v23 }
 0x589   : > { %v7161_v61 = vpop.eup %5900  ;;  %v3598_v29 = vmul.f32 1.442695, %v3551_v10 }
 0x58a   : > { %v3484_v49 = vpop.xlane.xlu0 %3483  ;;  %v3662_v19 = vsel %vm1527_vm3, %v7161_v61, 0.0 }
 0x58b   : > { %5906 = vpow2.f32 %v3598_v29  ;;  %v3550_v39 = vsub.f32 %v7019_v27, %v3484_v49  ;;  %3663 = vadd.xlane.f32.xlu0 %v3662_v19  ;;  %v7205_v29 = vpop.xlane.xlu1 %3534 }
 0x58c   : > { %5908 = vpow2.f32 %v3610_v33 }
 0x58d   : > { %v7167_v40 = vpop.eup %5902  ;;  %v3596_v53 = vmul.f32 1.442695, %v3550_v39 }
 0x58e   : > { %v3502_v41 = vpop.xlane.xlu0 %3501  ;;  %v3671_v42 = vsel %vm1527_vm3, %v7167_v40, 0.0 }
 0x58f   : > { %5910 = vpow2.f32 %v3596_v53  ;;  %v3556_v15 = vsub.f32 %v7025_v54, %v3502_v41  ;;  %3672 = vadd.xlane.f32.xlu1 %v3671_v42  ;;  %v7215_v53 = vld [vmem:[%s7562_s3] ss:$0 sm:$0xff] }
 0x590   : > { %5912 = vpow2.f32 %v3614_v28 }
 0x591   : > { %v7172_v14 = vpop.eup %5904  ;;  %v3608_v62 = vmul.f32 1.442695, %v3556_v15 }
 0x592   : > { %v3508_v35 = vpop.xlane.xlu0 %3507  ;;  %v3668_v27 = vsel %vm1527_vm3, %v7172_v14, 0.0 }
 0x593   : > { %5914 = vpow2.f32 %v3608_v62  ;;  %v3558_v48 = vsub.f32 %v7033_v37, %v3508_v35  ;;  %3669 = vadd.xlane.f32.xlu0 %v3668_v27 }
 0x595   : > { %v7177_v46 = vpop.eup %5906  ;;  %v3612_v11 = vmul.f32 1.442695, %v3558_v48 }
 0x596   : > { %v7179_v32 = vpop.xlane.xlu0 %3525  ;;  %v3677_v54 = vsel %vm1527_vm3, %v7177_v46, 0.0  ;;  %v7183_v50 = vpop.eup %5908 }
 0x597   : > { %5916 = vpow2.f32 %v3612_v11  ;;  %v3564_v18 = vsub.f32 %v7041_v45, %v7179_v32  ;;  %3678 = vadd.xlane.f32.xlu1 %v3677_v54  ;;  %v3695_v16 = vsel %vm1527_vm3, %v7183_v50, 0.0 }
 0x599   : > { %v7187_v43 = vpop.eup %5910 }
 0x59a   : > { %v3674_v37 = vsel %vm1527_vm3, %v7187_v43, 0.0  ;;  %v7193_v47 = vpop.eup %5912  ;;  %v7207_v49 = vpop.xlane.xlu0 %3531 }
 0x59b   : > { %3675 = vadd.xlane.f32.xlu0 %v3674_v37  ;;  %3696 = vadd.xlane.f32.xlu1 %v3695_v16  ;;  %v3701_v10 = vsel %vm1527_vm3, %v7193_v47, 0.0 }
 0x59d   : > { %v7195_v13 = vpop.eup %5914 }
 0x59e   : > { %v3692_v23 = vsel %vm1527_vm3, %v7195_v13, 0.0 }
 0x59f   : > { %3693 = vadd.xlane.f32.xlu0 %v3692_v23  ;;  %3702 = vadd.xlane.f32.xlu1 %v3701_v10 }
 0x5a1   : > { %v7201_v33 = vpop.eup %5916 }
 0x5a2   : > { %v3698_v51 = vsel %vm1527_vm3, %v7201_v33, 0.0 }
 0x5a3   : > { %3699 = vadd.xlane.f32.xlu0 %v3698_v51 }
 0x5f0   : > { %v3637_v19 = vpop.xlane.xlu1 %3636 }
 0x5f1   : > { %5918 = vrcp.f32 %v3637_v19 }
 0x5f4   : > { %v3634_v39 = vpop.xlane.xlu0 %3633 }
 0x5f5   : > { %5920 = vrcp.f32 %v3634_v39 }
 0x5f8   : > { %v3643_v28 = vpop.xlane.xlu1 %3642 }
 0x5f9   : > { %5922 = vrcp.f32 %v3643_v28 }
 0x5fb   : > { %v5919_v15 = vpop.eup %5918 }
 0x5fc   : > { %v3640_v41 = vpop.xlane.xlu0 %3639  ;;  %v5339_v42 = vpop.f32.mrb[30].mxu0  ;;  %v3761_v11 = vmul.f32 %v5919_v15, %v7101_v34 }
 0x5fd   : > { %5924 = vrcp.f32 %v3640_v41  ;;  %v2715_v62 = vadd.f32 %v5339_v42, %v7215_v53  ;;  %v2709_v35 = vpop.f32.mrb[31].mxu0 }
 0x5fe   : > { %v2710_v27 = vadd.f32 %v7215_v53, %v2709_v35 }
 0x5ff   : > { %v5921_v48 = vpop.eup %5920  ;;  %4610 = vst.msk [vmem:[%s7219_s8 + $0x8] sm:$0xff] %vm224_vm0, %v2715_v62 }
 0x600   : > { %v3760_v54 = vmul.f32 %v5921_v48, %v7106_v44  ;;  %v3649_v37 = vpop.xlane.xlu1 %3648  ;;  %4609 = vst.msk [vmem:[%s7219_s8] sm:$0xff] %vm224_vm0, %v2710_v27 }
 0x601   : > { %5926 = vrcp.f32 %v3649_v37 }
 0x602   : > { %v5618_v16 = vpack.c.bf16 %v3761_v11, %v3760_v54 }
 0x603   : > { %v5923_v51 = vpop.eup %5922 }
 0x604   : > { %v3646_v23 = vpop.xlane.xlu0 %3645  ;;  %5620 = vmatpush3.bf16.xpose.msk.msra.mxu0 %vm6755_vm5, %v5618_v16  ;;  %v5342_v10 = vpop.f32.mrb[32].mxu0  ;;  %v3763_v28 = vmul.f32 %v5923_v51, %v7111_v9 }
 0x605   : > { %5928 = vrcp.f32 %v3646_v23  ;;  %v2725_v19 = vadd.f32 %v5342_v10, %v7215_v53  ;;  %v2719_v39 = vpop.f32.mrb[33].mxu0  ;;  %5621 = vmatprep.subr.bf16.mxu0 %v6070_v58 }
 0x606   : > { %v2720_v34 = vadd.f32 %v7215_v53, %v2719_v39 }
 0x607   : > { %v5925_v44 = vpop.eup %5924  ;;  %4903 = vst.msk [vmem:[%s7219_s8 + $0x28] sm:$0xff] %vm224_vm0, %v2725_v19 }
 0x608   : > { %v3762_v41 = vmul.f32 %v5925_v44, %v7116_v3  ;;  %4902 = vst.msk [vmem:[%s7219_s8 + $0x20] sm:$0xff] %vm224_vm0, %v2720_v34  ;;  %v3655_v42 = vpop.xlane.xlu1 %3654  ;;  %v7238_v15 = vpop.f32.mrb[34].mxu0 }
 0x609   : > { %v7240_v62 = vpop.f32.mrb[35].mxu0  ;;  %v3491_v35 = vsel %vm1527_vm3, %v7238_v15, -inf  ;;  %5930 = vrcp.f32 %v3655_v42 }
 0x60a   : > { %3492 = vmax.xlane.f32.xlu0 %v3491_v35  ;;  %v5622_v27 = vpack.c.bf16 %v3763_v28, %v3762_v41  ;;  %v3488_v54 = vsel %vm1527_vm3, %v7240_v62, -inf }
 0x60b   : > { %v5927_v9 = vpop.eup %5926 }
 0x60c   : > { %v3652_v48 = vpop.xlane.xlu0 %3651  ;;  %v7244_v11 = vpop.f32.mrb[36].mxu0  ;;  %5624 = vmatpush3.bf16.xpose.msk.msra.mxu0 %vm6755_vm5, %v5622_v27  ;;  %v3765_v23 = vmul.f32 %v5927_v9, %v7121_v17 }
 0x60d   : > { %5932 = vrcp.f32 %v3652_v48  ;;  %v7248_v3 = vpop.f32.mrb[37].mxu0  ;;  %v3497_v37 = vsel %vm1527_vm3, %v7244_v11, -inf  ;;  %5633 = vmatprep.subr.bf16.mxu0 %v6070_v58 }
 0x60e   : > { %3489 = vmax.xlane.f32.xlu0 %v3488_v54  ;;  %3498 = vmax.xlane.f32.xlu1 %v3497_v37  ;;  %v3494_v39 = vsel %vm1527_vm3, %v7248_v3, -inf }
 0x60f   : > { %v5929_v16 = vpop.eup %5928 }
 0x610   : > { %v3764_v10 = vmul.f32 %v5929_v16, %v7126_v63  ;;  %v7257_v51 = vpop.f32.mrb[38].mxu0  ;;  %v3661_v35 = vpop.xlane.xlu1 %3660 }
 0x611   : > { %v7259_v19 = vpop.f32.mrb[39].mxu0  ;;  %v3515_v34 = vsel %vm1527_vm3, %v7257_v51, -inf }
 0x612   : > { %3495 = vmax.xlane.f32.xlu0 %v3494_v39  ;;  %3516 = vmax.xlane.f32.xlu1 %v3515_v34  ;;  %v5626_v44 = vpack.c.bf16 %v3765_v23, %v3764_v10  ;;  %v3512_v41 = vsel %vm1527_vm3, %v7259_v19, -inf  ;;  %v3658_v16 = vpop.xlane.xlu0 %3657 }
 0x613   : > { %v5931_v17 = vpop.eup %5930 }
 0x614   : > { %5628 = vmatpush3.bf16.xpose.msk.msra.mxu1 %vm6755_vm5, %v5626_v44  ;;  %v7267_v28 = vpop.f32.mrb[40].mxu0  ;;  %v3767_v48 = vmul.f32 %v5931_v17, %v7132_v8  ;;  %v7280_v23 = vpop.xlane.xlu1 %3666 }
 0x615   : > { %v7269_v63 = vpop.f32.mrb[41].mxu0  ;;  %v3521_v42 = vsel %vm1527_vm3, %v7267_v28, -inf  ;;  %5629 = vmatprep.subr.bf16.mxu1 %v6070_v58 }
 0x616   : > { %3513 = vmax.xlane.f32.xlu0 %v3512_v41  ;;  %3522 = vmax.xlane.f32.xlu1 %v3521_v42  ;;  %v3518_v54 = vsel %vm1527_vm3, %v7269_v63, -inf }
 0x617   : > { %v5933_v27 = vpop.eup %5932 }
 0x618   : > { %v3766_v9 = vmul.f32 %v5933_v27, %v7137_v12  ;;  %v3664_v10 = vpop.xlane.xlu0 %3663  ;;  %v3567_v27 = vsub.f32 %v7047_v30, %v7205_v29  ;;  %v3566_v30 = vsub.f32 %v7049_v57, %v7207_v49 }
 0x61a   : > { %3519 = vmax.xlane.f32.xlu0 %v3518_v54  ;;  %v5630_v37 = vpack.c.bf16 %v3767_v48, %v3766_v9 }
 0x61c   : > { %5632 = vmatpush3.bf16.xpose.msk.msra.mxu1 %vm6755_vm5, %v5630_v37  ;;  %v3673_v39 = vpop.xlane.xlu1 %3672  ;;  %v3630_v37 = vmul.f32 1.442695, %v3567_v27 }
 0x61d   : > { %5641 = vmatprep.subr.bf16.mxu1 %v6070_v58 }
 0x620   : > { %v3670_v34 = vpop.xlane.xlu0 %3669 }
 0x624   : > { %v3679_v44 = vpop.xlane.xlu1 %3678 }
 0x627   : > { %3878 = vrot.lane.b32.xlu1 %v6652_v60, %s6073_s29  ;;  %v3626_v60 = vmul.f32 1.442695, %v3565_v52 }
 0x628   : > { %v3676_v8 = vpop.xlane.xlu0 %3675  ;;  %v3697_v12 = vpop.xlane.xlu1 %3696 }
 0x629   : > { %5934 = vrcp.f32 %v3697_v12 }
 0x62c   : > { %v3694_v17 = vpop.xlane.xlu0 %3693  ;;  %v7325_v49 = vpop.xlane.xlu1 %3702 }
 0x62d   : > { %5936 = vrcp.f32 %v3694_v17 }
 0x62e   : > { %5938 = vpow2.f32 %v3626_v60 }
 0x62f   : > { %5940 = vpow2.f32 %v3630_v37 }
 0x630   : > { %3792 = vrot.lane.b32.xlu0 %v6655_v0, %s6073_s29  ;;  %v3624_v0 = vmul.f32 1.442695, %v3564_v18  ;;  %v7323_v29 = vpop.xlane.xlu0 %3699 }
 0x632   : > { %5942 = vpow2.f32 %v3624_v0 }
 0x633   : > { %v5935_v41 = vpop.eup %5934 }
 0x634   : > { %v7292_v48 = vmul.f32 %v5935_v41, %v7183_v50  ;;  %v3628_v50 = vmul.f32 1.442695, %v3566_v30 }
 0x636   : > { %5944 = vpow2.f32 %v3628_v50 }
 0x637   : > { %v5937_v42 = vpop.eup %5936  ;;  %5946 = vrcp.f32 %v3670_v34 }
 0x638   : > { %v7295_v9 = vmul.f32 %v5937_v42, %v7195_v13  ;;  %v7307_v13 = vpop.eup %5938  ;;  %5948 = vrcp.f32 %v3673_v39 }
 0x639   : > { %v7309_v56 = vpop.eup %5940  ;;  %v3719_v7 = vsel %vm1527_vm3, %v7307_v13, 0.0  ;;  %5950 = vrcp.f32 %v3658_v16 }
 0x63a   : > { %v5658_v54 = vpack.c.bf16 %v7292_v48, %v7295_v9  ;;  %v3725_v45 = vsel %vm1527_vm3, %v7309_v56, 0.0  ;;  %5952 = vrcp.f32 %v3661_v35 }
 0x63c   : > { %v7313_v52 = vpop.eup %5942 }
 0x63d   : > { %v3716_v57 = vsel %vm1527_vm3, %v7313_v52, 0.0 }
 0x640   : > { %v7319_v32 = vpop.eup %5944 }
 0x641   : > { %v3722_v18 = vsel %vm1527_vm3, %v7319_v32, 0.0  ;;  %v5947_v34 = vpop.eup %5946 }
 0x642   : > { %v5949_v50 = vpop.eup %5948  ;;  %v3772_v39 = vmul.f32 %v5947_v34, %v7172_v14 }
 0x643   : > { %v5951_v35 = vpop.eup %5950 }
 0x64b   : > { %3720 = vadd.xlane.f32.xlu1 %v3719_v7 }
 0x64f   : > { %3726 = vadd.xlane.f32.xlu1 %v3725_v45  ;;  %3717 = vadd.xlane.f32.xlu0 %v3716_v57  ;;  %v3768_v45 = vmul.f32 %v5951_v35, %v7150_v24 }
 0x653   : > { %3723 = vadd.xlane.f32.xlu0 %v3722_v18 }
 0x697   : > { %v3493_v12 = vpop.xlane.xlu0 %3492 }
 0x698   : > { %v3553_v17 = vsub.f32 %v7238_v15, %v3493_v12 }
 0x69a   : > { %v3602_v41 = vmul.f32 1.442695, %v3553_v17 }
 0x69b   : > { %v3490_v42 = vpop.xlane.xlu0 %3489  ;;  %v3499_v27 = vpop.xlane.xlu1 %3498 }
 0x69c   : > { %5954 = vpow2.f32 %v3602_v41  ;;  %v3552_v60 = vsub.f32 %v7240_v62, %v3490_v42 }
 0x69d   : > { %5956 = vrcp.f32 %v3676_v8  ;;  %v5953_v8 = vpop.eup %5952 }
 0x69e   : > { %v3600_v37 = vmul.f32 1.442695, %v3552_v60  ;;  %5958 = vrcp.f32 %v3679_v44  ;;  %v3773_v44 = vmul.f32 %v5949_v50, %v7167_v40  ;;  %v3769_v17 = vmul.f32 %v5953_v8, %v7144_v55 }
 0x69f   : > { %v3496_v0 = vpop.xlane.xlu0 %3495  ;;  %v3517_v30 = vpop.xlane.xlu1 %3516 }
 0x6a0   : > { %5960 = vpow2.f32 %v3600_v37  ;;  %v5642_v18 = vpack.c.bf16 %v3773_v44, %v3772_v39  ;;  %v5634_v60 = vpack.c.bf16 %v3769_v17, %v3768_v45  ;;  %v3561_v45 = vsub.f32 %v7257_v51, %v3517_v30 }
 0x6a1   : > { %5962 = vrcp.f32 %v3664_v10 }
 0x6a2   : > { %5964 = vrcp.f32 %v7280_v23 }
 0x6a3   : > { %v3514_v15 = vpop.xlane.xlu0 %3513  ;;  %v7330_v16 = vpop.xlane.xlu1 %3522 }
 0x6a4   : > { %v3563_v62 = vsub.f32 %v7267_v28, %v7330_v16  ;;  %v3560_v8 = vsub.f32 %v7259_v19, %v3514_v15 }
 0x6a6   : > { %v7336_v7 = vpop.eup %5954 }
 0x6a7   : > { %v3879_v57 = vpop.permute.xlu1 %3878  ;;  %v3520_v10 = vpop.xlane.xlu0 %3519  ;;  %v3683_v14 = vsel %vm1527_vm3, %v7336_v7, 0.0 }
 0x6a8   : > { %v5957_v12 = vpop.eup %5956  ;;  %3684 = vadd.xlane.f32.xlu1 %v3683_v14  ;;  %5427 = vmatmul.mubr.msk.f32.vlgmr.msra.gmra.mrb[66].mxu1 %vm1527_vm3, %v3879_v57  ;;  %v3616_v57 = vmul.f32 1.442695, %v3560_v8  ;;  %v3618_v14 = vmul.f32 1.442695, %v3561_v45 }
 0x6a9   : > { %v5959_v23 = vpop.eup %5958  ;;  %5644 = vmatpush3.bf16.xpose.msk.msra.mxu1 %vm6755_vm5, %v5642_v18  ;;  %5448 = vmatprep.mubr.msk.f32.mxu1 %vm6071_vm4, %v7616_v36  ;;  %v3774_v40 = vmul.f32 %v5957_v12, %v7187_v43 }
 0x6aa   : > { %v7347_v24 = vpop.eup %5960  ;;  %5645 = vmatprep.subr.bf16.mxu1 %v6070_v58  ;;  %v3775_v55 = vmul.f32 %v5959_v23, %v7177_v46 }
 0x6ab   : > { %v3793_v41 = vpop.permute.xlu0 %3792  ;;  %v3680_v42 = vsel %vm1527_vm3, %v7347_v24, 0.0  ;;  %v5963_v37 = vpop.eup %5962 }
 0x6ac   : > { %3681 = vadd.xlane.f32.xlu0 %v3680_v42  ;;  %5416 = vmatmul.mubr.msk.f32.vlgmr.msra.gmra.mrb[42].mxu0 %vm1527_vm3, %v3793_v41  ;;  %v5965_v34 = vpop.eup %5964  ;;  %v3770_v43 = vmul.f32 %v5963_v37, %v7161_v61  ;;  %v5646_v50 = vpack.c.bf16 %v3775_v55, %v3774_v40  ;;  %v3555_v61 = vsub.f32 %v7244_v11, %v3499_v27 }
 0x6ad   : > { %5636 = vmatpush3.bf16.xpose.msk.msra.mxu0 %vm6755_vm5, %v5634_v60  ;;  %5437 = vmatprep.mubr.msk.f32.mxu0 %vm6071_vm4, %v7616_v36  ;;  %v3771_v39 = vmul.f32 %v5965_v34, %v7155_v59  ;;  %v3554_v59 = vsub.f32 %v7248_v3, %v3496_v0 }
 0x6ae   : > { %5637 = vmatprep.subr.bf16.mxu0 %v6070_v58  ;;  %v3606_v35 = vmul.f32 1.442695, %v3555_v61 }
 0x6af   : > { %v5638_v46 = vpack.c.bf16 %v3771_v39, %v3770_v43  ;;  %v3604_v44 = vmul.f32 1.442695, %v3554_v59 }
 0x6b0   : > { %5966 = vpow2.f32 %v3606_v35 }
 0x6b1   : > { %5648 = vmatpush3.bf16.xpose.msk.msra.mxu1 %vm6755_vm5, %v5646_v50  ;;  %5968 = vpow2.f32 %v3604_v44 }
 0x6b2   : > { %5657 = vmatprep.subr.bf16.mxu1 %v6070_v58  ;;  %5970 = vpow2.f32 %v3616_v57 }
 0x6b3   : > { %5972 = vpow2.f32 %v3618_v14 }
 0x6b5   : > { %5640 = vmatpush3.bf16.xpose.msk.msra.mxu0 %vm6755_vm5, %v5638_v46 }
 0x6b6   : > { %5649 = vmatprep.subr.bf16.mxu0 %v6070_v58 }
 0x6b9   : > { %4050 = vrot.lane.b32.xlu1 %v6723_v6, %s6073_s29  ;;  %v3562_v6 = vsub.f32 %v7269_v63, %v3520_v10  ;;  %v3622_v10 = vmul.f32 1.442695, %v3563_v62 }
 0x6bb   : > { %v3620_v18 = vmul.f32 1.442695, %v3562_v6 }
 0x6bd   : > { %5974 = vpow2.f32 %v3620_v18 }
 0x6be   : > { %5976 = vpow2.f32 %v3622_v10 }
 0x6bf   : > { %5978 = vrcp.f32 %v7323_v29 }
 0x6c0   : > { %5980 = vrcp.f32 %v7325_v49 }
 0x6c2   : > { %3964 = vrot.lane.b32.xlu0 %v6725_v22, %s6073_s29  ;;  %v7377_v22 = vpop.eup %5966 }
 0x6c3   : > { %v7379_v11 = vpop.eup %5968  ;;  %v3689_v3 = vsel %vm1527_vm3, %v7377_v22, 0.0 }
 0x6c4   : > { %v7383_v19 = vpop.eup %5970  ;;  %v3686_v27 = vsel %vm1527_vm3, %v7379_v11, 0.0 }
 0x6c5   : > { %v3704_v51 = vsel %vm1527_vm3, %v7383_v19, 0.0  ;;  %v7389_v63 = vpop.eup %5972 }
 0x6c6   : > { %v3707_v0 = vsel %vm1527_vm3, %v7389_v63, 0.0 }
 0x6c7   : > { %v7393_v30 = vpop.eup %5974 }
 0x6c8   : > { %v3710_v15 = vsel %vm1527_vm3, %v7393_v30, 0.0  ;;  %v7406_v12 = vpop.eup %5976 }
 0x6c9   : > { %v3713_v23 = vsel %vm1527_vm3, %v7406_v12, 0.0  ;;  %v5979_v40 = vpop.eup %5978 }
 0x6ca   : > { %v3782_v29 = vmul.f32 %v5979_v40, %v7201_v33 }
 0x6dc   : > { %v3718_v17 = vpop.xlane.xlu0 %3717 }
 0x6dd   : > { %3690 = vadd.xlane.f32.xlu1 %v3689_v3 }
 0x6e1   : > { %3705 = vadd.xlane.f32.xlu1 %v3704_v51  ;;  %3687 = vadd.xlane.f32.xlu0 %v3686_v27 }
 0x6e5   : > { %3708 = vadd.xlane.f32.xlu0 %v3707_v0 }
 0x6e9   : > { %3711 = vadd.xlane.f32.xlu0 %v3710_v15 }
 0x6f2   : > { %4136 = vrot.lane.b32.xlu1 %v6731_v4, %s6073_s29  ;;  %v3721_v4 = vpop.xlane.xlu1 %3720 }
 0x6ff   : > { %4222 = vrot.lane.b32.xlu0 %v6727_v2, %s6073_s29  ;;  %v3727_v2 = vpop.xlane.xlu1 %3726 }
 0x703   : > { %4394 = vrot.lane.b32.xlu0 %v6743_v5, %s6073_s29  ;;  %v3724_v5 = vpop.xlane.xlu0 %3723 }
 0x716   : > { %3714 = vadd.xlane.f32.xlu1 %v3713_v23 }
 0x727   : > { %4308 = vrot.lane.b32.xlu1 %v6745_v31, %s6073_s29  ;;  %v5981_v31 = vpop.eup %5980  ;;  %s4912_s29 = sshll.u32 %s6123_s19, 10  ;;  %s7518_s19 = scalar_lea.sflag [#allocation3], %s188_s30 }
 0x728   : > { %v3783_v41 = vmul.f32 %v5981_v31, %v7193_v47  ;;  %s7507_s12 = scalar_lea.hbm %s7563_s4, %s4912_s29 }
 0x72a   : > { %v5662_v48 = vpack.c.bf16 %v3783_v41, %v3782_v29 }
 0x735   : > { %v3685_v28 = vpop.xlane.xlu1 %3684 }
 0x736   : > { %5982 = vrcp.f32 %v3685_v28 }
 0x739   : > { %v4051_v16 = vpop.permute.xlu1 %4050  ;;  %v3682_v62 = vpop.xlane.xlu0 %3681 }
 0x73a   : > { %5984 = vrcp.f32 %v3682_v62  ;;  %5449 = vmatmul.mubr.msk.f32.vlgmr.msra.gmra.mrb[68].mxu1 %vm1527_vm3, %v4051_v16 }
 0x73b   : > { %5660 = vmatpush3.bf16.xpose.msk.msra.mxu1 %vm6755_vm5, %v5658_v54  ;;  %5470 = vmatprep.mubr.msk.f32.mxu1 %vm6071_vm4, %v7616_v36  ;;  %5986 = vrcp.f32 %v3718_v17 }
 0x73c   : > { %5661 = vmatprep.subr.bf16.mxu1 %v6070_v58  ;;  %5988 = vrcp.f32 %v3721_v4 }
 0x73d   : > { %v3965_v49 = vpop.permute.xlu0 %3964 }
 0x73e   : > { %5438 = vmatmul.mubr.msk.f32.vlgmr.msra.gmra.mrb[44].mxu0 %vm1527_vm3, %v3965_v49 }
 0x73f   : > { %5459 = vmatprep.mubr.msk.f32.mxu0 %vm6071_vm4, %v7616_v36 }
 0x740   : > { %v5983_v9 = vpop.eup %5982 }
 0x741   : > { %v3777_v42 = vmul.f32 %v5983_v9, %v7336_v7 }
 0x743   : > { %5664 = vmatpush3.bf16.xpose.msk.msra.mxu1 %vm6755_vm5, %v5662_v48 }
 0x744   : > { %v5985_v54 = vpop.eup %5984  ;;  %5673 = vmatprep.subr.bf16.mxu1 %v6070_v58 }
 0x745   : > { %v3776_v33 = vmul.f32 %v5985_v54, %v7347_v24  ;;  %v5987_v34 = vpop.eup %5986 }
 0x746   : > { %v5989_v7 = vpop.eup %5988  ;;  %v3788_v24 = vmul.f32 %v5987_v34, %v7313_v52 }
 0x747   : > { %v5650_v60 = vpack.c.bf16 %v3777_v42, %v3776_v33  ;;  %v3789_v46 = vmul.f32 %v5989_v7, %v7307_v13 }
 0x749   : > { %5652 = vmatpush3.bf16.xpose.msk.msra.mxu0 %vm6755_vm5, %v5650_v60  ;;  %v5674_v35 = vpack.c.bf16 %v3789_v46, %v3788_v24 }
 0x74a   : > { %5653 = vmatprep.subr.bf16.mxu0 %v6070_v58 }
 0x76a   : > { %v3691_v47 = vpop.xlane.xlu1 %3690 }
 0x76b   : > { %5990 = vrcp.f32 %v3691_v47 }
 0x76e   : > { %v3688_v37 = vpop.xlane.xlu0 %3687  ;;  %v3706_v43 = vpop.xlane.xlu1 %3705 }
 0x76f   : > { %5992 = vrcp.f32 %v3688_v37 }
 0x770   : > { %5994 = vrcp.f32 %v3724_v5 }
 0x771   : > { %5996 = vrcp.f32 %v3727_v2 }
 0x772   : > { %v3709_v55 = vpop.xlane.xlu0 %3708 }
 0x773   : > { %5998 = vrcp.f32 %v3709_v55 }
 0x774   : > { %6000 = vrcp.f32 %v3706_v43 }
 0x775   : > { %v5991_v39 = vpop.eup %5990 }
 0x776   : > { %v3712_v50 = vpop.xlane.xlu0 %3711  ;;  %v3779_v44 = vmul.f32 %v5991_v39, %v7377_v22 }
 0x777   : > { %6002 = vrcp.f32 %v3712_v50 }
 0x779   : > { %v5993_v61 = vpop.eup %5992 }
 0x77a   : > { %v4223_v59 = vpop.permute.xlu0 %4222  ;;  %v5995_v8 = vpop.eup %5994  ;;  %v3778_v45 = vmul.f32 %v5993_v61, %v7379_v11 }
 0x77b   : > { %v3960_v57 = vpop.f32.mrb[66].mxu1  ;;  %5471 = vmatmul.mubr.msk.f32.vlgmr.msra.gmra.mrb[70].mxu1 %vm1527_vm3, %v4223_v59  ;;  %v5997_v14 = vpop.eup %5996  ;;  %v3790_v18 = vmul.f32 %v5995_v8, %v7319_v32 }
 0x77c   : > { %5676 = vmatpush3.bf16.xpose.msk.msra.mxu1 %vm6755_vm5, %v5674_v35  ;;  %v5428_v52 = vpop.f32.mrb[67].mxu1  ;;  %5492 = vmatprep.mubr.msk.f32.mxu1 %vm6071_vm4, %v7616_v36  ;;  %v5654_v13 = vpack.c.bf16 %v3779_v44, %v3778_v45  ;;  %v3791_v3 = vmul.f32 %v5997_v14, %v7309_v56  ;;  %v4137_v32 = vpop.permute.xlu1 %4136 }
 0x77d   : > { %5677 = vmatprep.subr.bf16.mxu1 %v6070_v58  ;;  %v5999_v6 = vpop.eup %5998 }
 0x77e   : > { %5656 = vmatpush3.bf16.xpose.msk.msra.mxu0 %vm6755_vm5, %v5654_v13  ;;  %v6001_v11 = vpop.eup %6000  ;;  %v3785_v27 = vmul.f32 %v5999_v6, %v7389_v63  ;;  %v5678_v0 = vpack.c.bf16 %v3791_v3, %v3790_v18  ;;  %v4395_v56 = vpop.permute.xlu0 %4394 }
 0x77f   : > { %v3874_v22 = vpop.f32.mrb[42].mxu0  ;;  %5665 = vmatprep.subr.bf16.mxu0 %v6070_v58  ;;  %v3784_v15 = vmul.f32 %v6001_v11, %v7383_v19 }
 0x780   : > { %4480 = vxpose.xlu1.b32.start [1/8] (short) (narrow) %v3874_v22, 32  ;;  %v5417_v51 = vpop.f32.mrb[43].mxu0 }
 0x781   : > { %v5666_v10 = vpack.c.bf16 %v3785_v27, %v3784_v15  ;;  %v6003_v63 = vpop.eup %6002 }
 0x782   : > { %v3786_v4 = vmul.f32 %v6003_v63, %v7393_v30 }
 0x784   : > { %5680 = vmatpush3.bf16.xpose.msk.msra.mxu1 %vm6755_vm5, %v5678_v0  ;;  %4481 = vxpose.xlu1.b32.cont [2/8] (short) (narrow) %v3960_v57, 32 }
 0x785   : > { %5460 = vmatmul.mubr.msk.f32.vlgmr.msra.gmra.mrb[46].mxu0 %vm1527_vm3, %v4137_v32 }
 0x786   : > { %5668 = vmatpush3.bf16.xpose.msk.msra.mxu0 %vm6755_vm5, %v5666_v10  ;;  %5481 = vmatprep.mubr.msk.f32.mxu0 %vm6071_vm4, %v7616_v36 }
 0x787   : > { %5669 = vmatprep.subr.bf16.mxu0 %v6070_v58 }
 0x78b   : > { %5493 = vmatmul.mubr.msk.f32.vlgmr.msra.gmra.mrb[72].mxu1 %vm1527_vm3, %v4395_v56 }
 0x7a3   : > { %v3715_v19 = vpop.xlane.xlu1 %3714 }
 0x7a4   : > { %6004 = vrcp.f32 %v3715_v19 }
 0x7a7   : > { %v4309_v58 = vpop.permute.xlu1 %4308 }
 0x7ae   : > { %v6005_v23 = vpop.eup %6004 }
 0x7af   : > { %v3787_v17 = vmul.f32 %v6005_v23, %v7406_v12 }
 0x7b1   : > { %v5670_v2 = vpack.c.bf16 %v3787_v17, %v3786_v4 }
 0x7b3   : > { %5672 = vmatpush3.bf16.xpose.msk.msra.mxu0 %vm6755_vm5, %v5670_v2 }
 0x7b4   : > { %5683 = vmatprep.subr.msk.bf16.mxu0 %vm6161_vm1, %v6859_v25 }
 0x7ba   : > { %5482 = vmatmul.mubr.msk.f32.vlgmr.msra.gmra.mrb[48].mxu0 %vm1527_vm3, %v4309_v58 }
 0x7bb   : > { %5686 = vmatpush3.bf16.xpose.msk.msra.mxu0 %vm6161_vm1, %v6859_v25 }
 0x7bc   : > { %5689 = vmatprep.subr.msk.bf16.mxu0 %vm6161_vm1, %v6876_v20 }
 0x7c3   : > { %5692 = vmatpush3.bf16.xpose.msk.msra.mxu0 %vm6161_vm1, %v6876_v20 }
 0x7c4   : > { %5695 = vmatprep.subr.msk.bf16.mxu0 %vm6161_vm1, %v6896_v21 }
 0x7cb   : > { %5698 = vmatpush3.bf16.xpose.msk.msra.mxu0 %vm6161_vm1, %v6896_v21 }
 0x7cc   : > { %5701 = vmatprep.subr.msk.bf16.mxu0 %vm6161_vm1, %v6918_v26 }
 0x7d3   : > { %5704 = vmatpush3.bf16.xpose.msk.msra.mxu0 %vm6161_vm1, %v6918_v26 }
 0x80d   : > { %v4132_v38 = vpop.f32.mrb[68].mxu1 }
 0x80e   : > { %v5450_v36 = vpop.f32.mrb[69].mxu1 }
 0x811   : > { %v4046_v25 = vpop.f32.mrb[44].mxu0 }
 0x812   : > { %4482 = vxpose.xlu1.b32.cont [3/8] (short) (narrow) %v4046_v25, 32  ;;  %v5439_v20 = vpop.f32.mrb[45].mxu0 }
 0x816   : > { %4483 = vxpose.xlu1.b32.cont [4/8] (short) (narrow) %v4132_v38, 32 }
 0x84e   : > { %v4304_v30 = vpop.f32.mrb[70].mxu1 }
 0x84f   : > { %v5472_v12 = vpop.f32.mrb[71].mxu1 }
 0x858   : > { %v4218_v5 = vpop.f32.mrb[46].mxu0 }
 0x859   : > { %4484 = vxpose.xlu1.b32.cont [5/8] (short) (narrow) %v4218_v5, 32  ;;  %v5461_v28 = vpop.f32.mrb[47].mxu0 }
 0x85d   : > { %4485 = vxpose.xlu1.b32.cont [6/8] (short) (narrow) %v4304_v30, 32 }
 0x85e   : > { %v4476_v21 = vpop.f32.mrb[72].mxu1 }
 0x85f   : > { %v5494_v16 = vpop.f32.mrb[73].mxu1 }
 0x88d   : > { %v4390_v62 = vpop.f32.mrb[48].mxu0 }
 0x88e   : > { %v5483_v40 = vpop.f32.mrb[49].mxu0  ;;  %4486 = vxpose.xlu1.b32.cont [7/8] (short) (narrow) %v4390_v62, 32 }
 0x892   : > { %4487 = vxpose.xlu1.b32.end [8/8] (short) (narrow) %v4476_v21, 32 }
 0x8f6   : > { %v4496_v1 = vpop.trf.xlu1 }
 0x8f7   : > { %5511 = vmatprep.mubr.msk.f32.mxu0 %vm224_vm0, %v4496_v1 }
 0x8fa   : > { %v4497_v26 = vpop.trf.xlu1 }
 0x8fb   : > { %5512 = vmatmul.mubr.msk.f32.vlgmr.msra.gmra.mrb[50].mxu0 %vm224_vm0, %v4497_v26 }
 0x8fe   : > { %v4498_v31 = vpop.trf.xlu1 }
 0x8ff   : > { %5514 = vmatprep.mubr.msk.f32.mxu0 %vm224_vm0, %v4498_v31 }
 0x902   : > { %v4499_v29 = vpop.trf.xlu1 }
 0x903   : > { %5515 = vmatmul.mubr.msk.f32.gmra.mrb[52].mxu0 %vm224_vm0, %v4499_v29 }
 0x9ce   : > { %v5513_v49 = vpop.f32.mrb[50].mxu0 }
 0x9cf   : > { %v4596_v41 = vadd.f32 %v5513_v49, %v7215_v53  ;;  %v4590_v48 = vpop.f32.mrb[51].mxu0 }
 0x9d0   : > { %v4591_v9 = vadd.f32 %v7215_v53, %v4590_v48 }
 0x9d1   : > { %4905 = vst.msk [vmem:[%s7219_s8 + $0x38] sm:$0xff] %vm224_vm0, %v4596_v41 }
 0x9d2   : > { %4904 = vst.msk [vmem:[%s7219_s8 + $0x30] sm:$0xff] %vm224_vm0, %v4591_v9 }
 0x9d6   : > { %v5516_v54 = vpop.f32.mrb[52].mxu0 }
 0x9d7   : > { %v4606_v42 = vadd.f32 %v5516_v54, %v7215_v53  ;;  %v4600_v33 = vpop.f32.mrb[53].mxu0 }
 0x9d8   : > { %v4601_v60 = vadd.f32 %v7215_v53, %v4600_v33 }
 0x9d9   : > { %4901 = vst.msk [vmem:[%s7219_s8 + $0x18] sm:$0xff] %vm224_vm0, %v4606_v42 }
 0x9da   : > { %4900 = vst.msk [vmem:[%s7219_s8 + $0x10] sm:$0xff] %vm224_vm0, %v4601_v60 }
 0x9db   : > { %6019 = shalt.err (!%p6016_p3)
}
 0x9dc   : > { %s6020_s23 = scalar_lea.hbm %s7507_s12, 1024  ;;  %s6024_s30 = scalar_lea.hbm %s7563_s4, 2048 }
 0x9dd   : > { %p6021_p4 = scmp.ne.s32.totalorder %s7507_s12, %s6020_s23  ;;  %p6025_p9 = scmp.lt.u32.totalorder %s7507_s12, %s7563_s4 }
 0x9de   : > { %p6026_p10 = scmp.lt.u32.totalorder %s6024_s30, %s6020_s23  ;;  %p6028_p12 = scmp.lt.u32.totalorder %s6020_s23, %s7507_s12 }
 0x9df   : > { %p6022_p7 = pnand %p6021_p4, %p6140_p5 }
 0x9e0   : > { %p6027_p11 = por %p6026_p10, %p6025_p9 }
 0x9e1   : > { %p6023_p8 = pneg %p6022_p7 }
 0x9e2   : > { %p6029_p13 = por %p6028_p12, %p6027_p11 }
 0x9e4   : > { %p6030_p0 = pnand %p6029_p13, %p6023_p8 }
 0x9e6   : > { %6033 = shalt.err (!%p6030_p0)
}
 0x9e7   : > { %s6075_s7 = smov 128   ;;  %s6076_s8 = smov 8  }
 0x9e8   : > { %5705 = dma.vmem_to_hbm [thread:$0]  (%p6140_p5), %s7509_s9, 1024, %s7507_s12, %s7518_s19, %s6075_s7, %s6075_s7, %s6076_s8  }
 0x9e9 PF: > { %p5711_p1 = scmp.ge.s32.totalorder %s6068_s18, 2  ;;  %s4649_s29 = sand.u32 1, %s6056_s15  }
 0x9ea   : > { %s4650_s10 = scalar_lea.sflag [#allocation3], %s4649_s29 }
 0x9eb   : > { %p5708_p2 = pnand %p5711_p1, %p6144_p6 }
 0x9ed   : > { %6051 = dma.done.wait (!%p5708_p2), %s4650_s10, 1024  }
 0x9ee   : > { %6053 = vsyncadd (!%p5708_p2), %s4650_s10, 4294966272  ;;  %p14_p3 = scmp.ge.s32.totalorder %s6127_s21, 4   ;;  %s7639_s15 = smov %s6060_s16 }
 0x9ef   : > { %s7640_s16 = smov %s6064_s17  ;;  %s7641_s17 = smov %s6138_s24 }
 0x9f0   : > { %s7642_s18 = smov %s6127_s21  ;;  %16 = sbr.rel (!%p14_p3) target bundleno = 3 (0x3), region = 74 }
 0x9f7   :  { %4655 = vsyncpa [#allocation3], 1 }
 0x9f8   :  { %4657 = vsyncpa [#allocation3 + $0x1], 1 }

</bundles_post_ra>
